<compile_context>
chip_gen: v5e
topology: v5e:2x2
jax: 0.10.0
libtpu: 0.0.40
codegen_flags: <defaults>
</compile_context>

<pallas_src>
import functools

import jax
import jax.numpy as jnp
from jax.experimental import pallas as pl
from jax.experimental.pallas import tpu as pltpu


def _round_up(x, m):
    return (x + m - 1) // m * m


def sieu_kernel(x2_ref, x3_ref, fg_ref, w9x_ref, w9y_ref, b1_ref,
                wa_ref, ba_ref, wb_ref, bb_ref, out_ref, xpad_scr,
                *, W, padl):
    """One grid step: NB images, full spatial extent.

    x2_ref : (NB, C, HW) f32     x3_ref : (NB, C, HW) cdt   fg_ref: (NB, Cf, HW) cdt
    w9x_ref/w9y_ref : (9, C, C)  folded conv_1 weights, x2-half / x3-half
    b1/ba/bb : (*, 1) f32        wa : (Cr, C) cdt           wb : (C, Cr) cdt
    xpad_scr : (2, C, padl + HW + padl) cdt   flat zero-padded staging buffer
    """
    NB, C, HW = out_ref.shape
    cdt = xpad_scr.dtype

    # Column masks built once per step (multiplicative, compute dtype).
    # They zero the row-wrap reads of the dw = -1 / +1 taps; the dh = +-1
    # boundary reads land in the physical zero pads of the scratch.
    ww = jax.lax.broadcasted_iota(jnp.int32, (1, HW), 1) % W
    mask_l = (ww >= 1).astype(cdt)           # taps with dw = -1
    mask_r = (ww <= W - 2).astype(cdt)       # taps with dw = +1

    # Zero the flat pads once per grid step (they never hold payload).
    zpad = jnp.zeros((2, C, padl), cdt)
    xpad_scr[:, :, 0:padl] = zpad
    xpad_scr[:, :, padl + HW:padl + HW + padl] = zpad

    # Static loop over the batch tile: amortizes resident weights and the
    # per-step pipeline overhead when C / HW are small.
    for nb in range(NB):
        # ---- stage x2 / x3 into the zero-padded scratch (no concat) ----
        xpad_scr[0, :, padl:padl + HW] = x2_ref[nb].astype(cdt)
        xpad_scr[1, :, padl:padl + HW] = x3_ref[nb].astype(cdt)

        # ---- conv_1: 9 taps, accumulating MXU matmuls (no im2col slab) ----
        acc = jnp.zeros((C, HW), jnp.float32)
        for kh in range(3):
            for kw in range(3):
                dh, dw = kh - 1, kw - 1
                t = kh * 3 + kw
                off = padl + dh * W + dw          # static lane offset
                xs2 = xpad_scr[0, :, off:off + HW]
                xs3 = xpad_scr[1, :, off:off + HW]
                if dw == -1:
                    xs2 = xs2 * mask_l
                    xs3 = xs3 * mask_l
                elif dw == 1:
                    xs2 = xs2 * mask_r
                    xs3 = xs3 * mask_r
                acc = acc + jnp.dot(w9x_ref[t], xs2,
                                    preferred_element_type=jnp.float32)
                acc = acc + jnp.dot(w9y_ref[t], xs3,
                                    preferred_element_type=jnp.float32)

        # conv_1 + folded BN + ReLU, then * fg (f32, exact for the output)
        y = jnp.maximum(acc + b1_ref[...], 0.0)
        ycat = y * fg_ref[nb].astype(jnp.float32)          # (C, HW) f32
        ycat_c = ycat.astype(cdt)                          # MXU operand dtype

        # ---- local_att: 1x1 conv + BN + ReLU + 1x1 conv + BN (BN folded) ----
        z = jnp.dot(wa_ref[...], ycat_c,
                    preferred_element_type=jnp.float32) + ba_ref[...]
        z = jnp.maximum(z, 0.0).astype(cdt)                # (Cr, HW)
        att = jnp.dot(wb_ref[...], z,
                      preferred_element_type=jnp.float32) + bb_ref[...]

        # ---- out = sigmoid(y_att) * y_cat + x2 (x2 re-read from VMEM) ----
        out_ref[nb] = jax.nn.sigmoid(att) * ycat + x2_ref[nb]


def _pick_batch_tile(N, C, Cf, HW, padl, cbytes, budget=24 * 2**20, cap=8):
    """Largest divisor of N (<= cap) whose double-buffered blocks + scratch fit."""
    per_img = (C * HW * 4            # x2 (f32)
               + C * HW * cbytes     # x3
               + Cf * HW * cbytes    # fg
               + C * HW * 4)         # out (f32)
    scratch = 2 * C * (HW + 2 * padl) * cbytes
    for cand in range(min(N, cap), 0, -1):
        if N % cand == 0 and 2 * cand * per_img + scratch <= budget:
            return cand
    return 1


def sieu_forward(x2, x3, fg, p, eps=1e-5, compute_dtype=jnp.float32):
    """SIEU forward.  NCHW in / NCHW out (PyTorch convention).

    On v5e prefer compute_dtype=float32 (no native bf16 VPU/EUP); on v6e/v7x
    bfloat16 halves input HBM traffic and MXU passes (f32 accumulation kept).
    """
    N, C, H, W = x2.shape
    if x3.shape[2:] != x2.shape[2:]:
        # TODO(synk): antialias=False matches F.interpolate(align_corners=False)
        # for upsampling; re-check border behavior if downsampling is ever used.
        x3 = jax.image.resize(x3, x3.shape[:2] + x2.shape[2:],
                              method="bilinear", antialias=False)
    if fg.shape[2:] != x2.shape[2:]:
        fg = jax.image.resize(fg, fg.shape[:2] + x2.shape[2:],
                              method="bilinear", antialias=False)

    Cr = p["convA_w"].shape[0]
    Cf = fg.shape[1]
    HW = H * W
    cdt = jnp.dtype(compute_dtype)
    cbytes = cdt.itemsize
    padl = _round_up(W + 1, 128)          # lane-aligned flat pad on each side

    # ---- eval-mode BN folding (done once in the wrapper) ----
    s1 = p["gamma1"] / jnp.sqrt(p["var1"] + eps)
    wfold = p["conv1_w"] * s1[:, None, None, None]              # (C, 2C, 3, 3)
    w9 = jnp.transpose(wfold, (2, 3, 0, 1)).reshape(9, C, 2 * C)
    w9x = w9[:, :, :C].astype(cdt)                              # x2 half
    w9y = w9[:, :, C:].astype(cdt)                              # x3 half
    b1 = (p["beta1"] - p["mean1"] * s1).reshape(C, 1).astype(jnp.float32)

    s2 = p["gamma2"] / jnp.sqrt(p["var2"] + eps)
    wa = (p["convA_w"][:, :, 0, 0] * s2[:, None]).astype(cdt)   # (Cr, C)
    ba = ((p["convA_b"] - p["mean2"]) * s2
          + p["beta2"]).reshape(Cr, 1).astype(jnp.float32)
    s3 = p["gamma3"] / jnp.sqrt(p["var3"] + eps)
    wb = (p["convB_w"][:, :, 0, 0] * s3[:, None]).astype(cdt)   # (C, Cr)
    bb = ((p["convB_b"] - p["mean3"]) * s3
          + p["beta3"]).reshape(C, 1).astype(jnp.float32)

    # lane-dense (N, C, H*W) views: free reshapes, no transpose / concat / pad.
    x2r = x2.reshape(N, C, HW).astype(jnp.float32)   # f32 for exact residual
    x3r = x3.reshape(N, C, HW).astype(cdt)
    fgr = fg.reshape(N, Cf, HW).astype(cdt)

    NB = _pick_batch_tile(N, C, Cf, HW, padl, cbytes)
    grid = (N // NB,)

    # VMEM budget: double-buffered blocks + scratch, with margin; floor 32 MiB.
    blk_bytes = NB * (C * HW * 4 + C * HW * cbytes + Cf * HW * cbytes + C * HW * 4)
    scratch_bytes = 2 * C * (HW + 2 * padl) * cbytes
    vmem_limit = int(min(100 * 2**20,
                         max(32 * 2**20, 3 * (2 * blk_bytes + scratch_bytes))))

    kernel = functools.partial(sieu_kernel, W=W, padl=padl)

    out = pl.pallas_call(
        kernel,
        out_shape=jax.ShapeDtypeStruct((N, C, HW), jnp.float32),
        grid_spec=pltpu.PrefetchScalarGridSpec(
            num_scalar_prefetch=0,
            grid=grid,
            in_specs=[
                pl.BlockSpec((NB, C, HW), lambda n: (n, 0, 0)),     # x2 (f32)
                pl.BlockSpec((NB, C, HW), lambda n: (n, 0, 0)),     # x3 (cdt)
                pl.BlockSpec((NB, Cf, HW), lambda n: (n, 0, 0)),    # fg (cdt)
                pl.BlockSpec((9, C, C), lambda n: (0, 0, 0)),       # conv_1 w (x2 half)
                pl.BlockSpec((9, C, C), lambda n: (0, 0, 0)),       # conv_1 w (x3 half)
                pl.BlockSpec((C, 1), lambda n: (0, 0)),             # conv_1 folded bias
                pl.BlockSpec((Cr, C), lambda n: (0, 0)),            # local_att A w
                pl.BlockSpec((Cr, 1), lambda n: (0, 0)),            # local_att A b
                pl.BlockSpec((C, Cr), lambda n: (0, 0)),            # local_att B w
                pl.BlockSpec((C, 1), lambda n: (0, 0)),             # local_att B b
            ],
            out_specs=pl.BlockSpec((NB, C, HW), lambda n: (n, 0, 0)),
            scratch_shapes=[pltpu.VMEM((2, C, HW + 2 * padl), cdt)],
        ),
        compiler_params=pltpu.CompilerParams(
            dimension_semantics=("parallel",),
            vmem_limit_bytes=vmem_limit,
        ),
    )(x2r, x3r, fgr, w9x, w9y, b1, wa, ba, wb, bb)

    return out.reshape(N, C, H, W)


def sieu_reference(x2, x3, fg, p, eps=1e-5):
    """Pure-JAX NCHW reference mirroring the PyTorch forward (eval-mode BN)."""
    if x3.shape[2:] != x2.shape[2:]:
        x3 = jax.image.resize(x3, x3.shape[:2] + x2.shape[2:],
                              method="bilinear", antialias=False)
    if fg.shape[2:] != x2.shape[2:]:
        fg = jax.image.resize(fg, fg.shape[:2] + x2.shape[2:],
                              method="bilinear", antialias=False)

    def bn(v, g, b, m, var):
        return ((v - m[None, :, None, None])
                / jnp.sqrt(var[None, :, None, None] + eps)
                * g[None, :, None, None] + b[None, :, None, None])

    xc = jnp.concatenate([x2, x3], axis=1)
    y = jax.lax.conv_general_dilated(
        xc, p["conv1_w"], (1, 1), ((1, 1), (1, 1)),
        dimension_numbers=("NCHW", "OIHW", "NCHW"),
        precision=jax.lax.Precision.HIGHEST)
    y = jnp.maximum(bn(y, p["gamma1"], p["beta1"], p["mean1"], p["var1"]), 0.0)
    ycat = y * fg

    z = jnp.einsum("oc,nchw->nohw", p["convA_w"][:, :, 0, 0], ycat,
                   precision=jax.lax.Precision.HIGHEST)
    z = z + p["convA_b"][None, :, None, None]
    z = jnp.maximum(bn(z, p["gamma2"], p["beta2"], p["mean2"], p["var2"]), 0.0)
    att = jnp.einsum("or,nrhw->nohw", p["convB_w"][:, :, 0, 0], z,
                     precision=jax.lax.Precision.HIGHEST)
    att = att + p["convB_b"][None, :, None, None]
    att = bn(att, p["gamma3"], p["beta3"], p["mean3"], p["var3"])
    return jax.nn.sigmoid(att) * ycat + x2


def init_params(key, channels, r=4):
    C = channels
    Cr = C // r
    ks = jax.random.split(key, 17)
    return {
        "conv1_w": jax.random.normal(ks[0], (C, 2 * C, 3, 3), jnp.float32) * 0.1,
        "gamma1": jax.random.uniform(ks[1], (C,), jnp.float32, 0.5, 1.5),
        "beta1": jax.random.normal(ks[2], (C,), jnp.float32) * 0.1,
        "mean1": jax.random.normal(ks[3], (C,), jnp.float32) * 0.1,
        "var1": jax.random.uniform(ks[4], (C,), jnp.float32, 0.5, 1.5),
        "convA_w": jax.random.normal(ks[5], (Cr, C, 1, 1), jnp.float32) * 0.2,
        "convA_b": jax.random.normal(ks[6], (Cr,), jnp.float32) * 0.1,
        "gamma2": jax.random.uniform(ks[7], (Cr,), jnp.float32, 0.5, 1.5),
        "beta2": jax.random.normal(ks[8], (Cr,), jnp.float32) * 0.1,
        "mean2": jax.random.normal(ks[9], (Cr,), jnp.float32) * 0.05,
        "var2": jax.random.uniform(ks[10], (Cr,), jnp.float32, 0.5, 1.5),
        "convB_w": jax.random.normal(ks[11], (C, Cr, 1, 1), jnp.float32) * 0.2,
        "convB_b": jax.random.normal(ks[12], (C,), jnp.float32) * 0.1,
        "gamma3": jax.random.uniform(ks[13], (C,), jnp.float32, 0.5, 1.5),
        "beta3": jax.random.normal(ks[14], (C,), jnp.float32) * 0.1,
        "mean3": jax.random.normal(ks[15], (C,), jnp.float32) * 0.05,
        "var3": jax.random.uniform(ks[16], (C,), jnp.float32, 0.5, 1.5),
    }


if __name__ == "__main__":
    N, C, H, W = 2, 8, 16, 16            # SIEU(channels=8, r=4)
    key = jax.random.PRNGKey(0)
    k1, k2, k3, k4 = jax.random.split(key, 4)
    x2 = jax.random.normal(k1, (N, C, H, W), jnp.float32)
    x3 = jax.random.normal(k2, (N, C, H // 2, W // 2), jnp.float32)  # low-res feature
    fg = jax.random.uniform(k3, (N, 1, H, W), jnp.float32)           # foreground prior
    params = init_params(k4, C, r=4)

    ref = jax.block_until_ready(sieu_reference(x2, x3, fg, params))

    # strict check: f32 compute path
    out_f32 = jax.block_until_ready(
        sieu_forward(x2, x3, fg, params, compute_dtype=jnp.float32))
    assert out_f32.shape == (N, C, H, W), out_f32.shape
    err32 = float(jnp.max(jnp.abs(out_f32 - ref)))
    assert jnp.allclose(out_f32, ref, atol=1e-3, rtol=1e-3), err32

    # fast path: bf16 inputs/weights (incl. 1x1 attention matmuls), f32 MXU acc
    out_bf16 = jax.block_until_ready(
        sieu_forward(x2, x3, fg, params, compute_dtype=jnp.bfloat16))
    errbf = float(jnp.max(jnp.abs(out_bf16 - ref)))
    assert jnp.allclose(out_bf16, ref, atol=2e-1, rtol=2e-1), errbf

    print("KERNEL_OK")
</pallas_src>

<mosaic_0001>
module attributes {stable_mosaic.version = 11 : i64} {
  func.func @sieu_kernel(%arg0: i32, %arg1: memref<2x8x256xf32, #tpu.memory_space<vmem>>, %arg2: memref<2x8x256xf32, #tpu.memory_space<vmem>>, %arg3: memref<2x1x256xf32, #tpu.memory_space<vmem>>, %arg4: memref<9x8x8xf32, #tpu.memory_space<vmem>>, %arg5: memref<9x8x8xf32, #tpu.memory_space<vmem>>, %arg6: memref<8x1xf32, #tpu.memory_space<vmem>>, %arg7: memref<2x8xf32, #tpu.memory_space<vmem>>, %arg8: memref<2x1xf32, #tpu.memory_space<vmem>>, %arg9: memref<8x2xf32, #tpu.memory_space<vmem>>, %arg10: memref<8x1xf32, #tpu.memory_space<vmem>>, %arg11: memref<2x8x256xf32, #tpu.memory_space<vmem>>, %arg12: memref<2x8x512xf32, #tpu.memory_space<vmem>>) attributes {dimension_semantics = [#tpu.dimension_semantics<parallel>], iteration_bounds = array<i64: 1>, scalar_prefetch = 0 : i64, scratch_operands = 1 : i64, tpu.core_type = #tpu.core_type<tc>, window_params = [{transform_indices = @transform_0, window_bounds = array<i64: 2, 8, 256>}, {transform_indices = @transform_1, window_bounds = array<i64: 2, 8, 256>}, {transform_indices = @transform_2, window_bounds = array<i64: 2, 1, 256>}, {pipeline_mode = #tpu.pipeline_mode<synchronous>, transform_indices = @transform_3, window_bounds = array<i64: 9, 8, 8>}, {pipeline_mode = #tpu.pipeline_mode<synchronous>, transform_indices = @transform_4, window_bounds = array<i64: 9, 8, 8>}, {pipeline_mode = #tpu.pipeline_mode<synchronous>, transform_indices = @transform_5, window_bounds = array<i64: 8, 1>}, {pipeline_mode = #tpu.pipeline_mode<synchronous>, transform_indices = @transform_6, window_bounds = array<i64: 2, 8>}, {pipeline_mode = #tpu.pipeline_mode<synchronous>, transform_indices = @transform_7, window_bounds = array<i64: 2, 1>}, {pipeline_mode = #tpu.pipeline_mode<synchronous>, transform_indices = @transform_8, window_bounds = array<i64: 8, 2>}, {pipeline_mode = #tpu.pipeline_mode<synchronous>, transform_indices = @transform_9, window_bounds = array<i64: 8, 1>}, {transform_indices = @transform_10, window_bounds = array<i64: 2, 8, 256>}]} {
    %0 = tpu.iota {dimensions = array<i32: 1>} : vector<1x256xi32>
    %c16_i32 = arith.constant 16 : i32
    %c0_i32 = arith.constant 0 : i32
    %1 = arith.cmpi eq, %c16_i32, %c0_i32 : i32
    %c1_i32 = arith.constant 1 : i32
    %2 = arith.select %1, %c1_i32, %c16_i32 : i32
    %3 = vector.broadcast %2 : i32 to vector<1x256xi32>
    %4 = arith.remsi %0, %3 : vector<1x256xi32>
    %c0_i32_0 = arith.constant 0 : i32
    %5 = vector.broadcast %c0_i32_0 : i32 to vector<1x256xi32>
    %6 = arith.cmpi ne, %4, %5 : vector<1x256xi32>
    %c0_i32_1 = arith.constant 0 : i32
    %7 = vector.broadcast %c0_i32_1 : i32 to vector<1x256xi32>
    %8 = arith.cmpi slt, %4, %7 : vector<1x256xi32>
    %c0_i32_2 = arith.constant 0 : i32
    %9 = arith.cmpi slt, %2, %c0_i32_2 : i32
    %10 = vector.broadcast %9 : i1 to vector<1x256xi1>
    %11 = vector.broadcast %10 : vector<1x256xi1> to vector<1x256xi1>
    %12 = arith.xori %8, %11 : vector<1x256xi1>
    %13 = arith.andi %12, %6 : vector<1x256xi1>
    %14 = vector.broadcast %2 : i32 to vector<1x256xi32>
    %15 = arith.addi %4, %14 : vector<1x256xi32>
    %16 = arith.select %13, %15, %4 : vector<1x256xi1>, vector<1x256xi32>
    %c1_i32_3 = arith.constant 1 : i32
    %17 = vector.broadcast %c1_i32_3 : i32 to vector<1x256xi32>
    %18 = arith.cmpi sge, %16, %17 : vector<1x256xi32>
    %19 = arith.extui %18 : vector<1x256xi1> to vector<1x256xi32>
    %20 = arith.sitofp %19 : vector<1x256xi32> to vector<1x256xf32>
    %c14_i32 = arith.constant 14 : i32
    %21 = vector.broadcast %c14_i32 : i32 to vector<1x256xi32>
    %22 = arith.cmpi sle, %16, %21 : vector<1x256xi32>
    %23 = arith.extui %22 : vector<1x256xi1> to vector<1x256xi32>
    %24 = arith.sitofp %23 : vector<1x256xi32> to vector<1x256xf32>
    %cst = arith.constant 0.000000e+00 : f32
    %25 = vector.broadcast %cst : f32 to vector<2x8x128xf32>
    %c0 = arith.constant 0 : index
    %c0_4 = arith.constant 0 : index
    %c0_5 = arith.constant 0 : index
    %26 = vector.load %arg12[%c0, %c0_4, %c0_5] : memref<2x8x512xf32, #tpu.memory_space<vmem>>, vector<2x8x128xf32>
    tpu.vector_store %arg12[%c0, %c0_4, %c0_5], %25 {strides = array<i32>} : memref<2x8x512xf32, #tpu.memory_space<vmem>>, vector<2x8x128xf32>,
    %c0_6 = arith.constant 0 : index
    %c0_7 = arith.constant 0 : index
    %c384 = arith.constant 384 : index
    %27 = vector.load %arg12[%c0_6, %c0_7, %c384] : memref<2x8x512xf32, #tpu.memory_space<vmem>>, vector<2x8x128xf32>
    tpu.vector_store %arg12[%c0_6, %c0_7, %c384], %25 {strides = array<i32>} : memref<2x8x512xf32, #tpu.memory_space<vmem>>, vector<2x8x128xf32>,
    %c0_8 = arith.constant 0 : index
    %c0_9 = arith.constant 0 : index
    %c0_10 = arith.constant 0 : index
    %28 = vector.load %arg1[%c0_8, %c0_9, %c0_10] : memref<2x8x256xf32, #tpu.memory_space<vmem>>, vector<1x8x256xf32>
    %29 = vector.shape_cast %28 : vector<1x8x256xf32> to vector<8x256xf32>
    %c0_11 = arith.constant 0 : index
    %c0_12 = arith.constant 0 : index
    %c128 = arith.constant 128 : index
    %30 = vector.load %arg12[%c0_11, %c0_12, %c128] : memref<2x8x512xf32, #tpu.memory_space<vmem>>, vector<1x8x256xf32>
    %31 = vector.shape_cast %30 : vector<1x8x256xf32> to vector<8x256xf32>
    %32 = vector.shape_cast %29 : vector<8x256xf32> to vector<1x8x256xf32>
    tpu.vector_store %arg12[%c0_11, %c0_12, %c128], %32 {strides = array<i32>} : memref<2x8x512xf32, #tpu.memory_space<vmem>>, vector<1x8x256xf32>,
    %c0_13 = arith.constant 0 : index
    %c0_14 = arith.constant 0 : index
    %c0_15 = arith.constant 0 : index
    %33 = vector.load %arg2[%c0_13, %c0_14, %c0_15] : memref<2x8x256xf32, #tpu.memory_space<vmem>>, vector<1x8x256xf32>
    %34 = vector.shape_cast %33 : vector<1x8x256xf32> to vector<8x256xf32>
    %c1 = arith.constant 1 : index
    %c0_16 = arith.constant 0 : index
    %c128_17 = arith.constant 128 : index
    %35 = vector.load %arg12[%c1, %c0_16, %c128_17] : memref<2x8x512xf32, #tpu.memory_space<vmem>>, vector<1x8x256xf32>
    %36 = vector.shape_cast %35 : vector<1x8x256xf32> to vector<8x256xf32>
    %37 = vector.shape_cast %34 : vector<8x256xf32> to vector<1x8x256xf32>
    tpu.vector_store %arg12[%c1, %c0_16, %c128_17], %37 {strides = array<i32>} : memref<2x8x512xf32, #tpu.memory_space<vmem>>, vector<1x8x256xf32>,
    %cst_18 = arith.constant 0.000000e+00 : f32
    %38 = vector.broadcast %cst_18 : f32 to vector<8x256xf32>
    %c0_19 = arith.constant 0 : index
    %c0_20 = arith.constant 0 : index
    %c111 = arith.constant 111 : index
    %39 = vector.load %arg12[%c0_19, %c0_20, %c111] : memref<2x8x512xf32, #tpu.memory_space<vmem>>, vector<1x8x256xf32>
    %40 = vector.shape_cast %39 : vector<1x8x256xf32> to vector<8x256xf32>
    %c1_21 = arith.constant 1 : index
    %c0_22 = arith.constant 0 : index
    %c111_23 = arith.constant 111 : index
    %41 = vector.load %arg12[%c1_21, %c0_22, %c111_23] : memref<2x8x512xf32, #tpu.memory_space<vmem>>, vector<1x8x256xf32>
    %42 = vector.shape_cast %41 : vector<1x8x256xf32> to vector<8x256xf32>
    %43 = vector.broadcast %20 : vector<1x256xf32> to vector<8x256xf32>
    %44 = arith.mulf %40, %43 : vector<8x256xf32>
    %45 = vector.broadcast %20 : vector<1x256xf32> to vector<8x256xf32>
    %46 = arith.mulf %42, %45 : vector<8x256xf32>
    %c0_24 = arith.constant 0 : index
    %c0_25 = arith.constant 0 : index
    %c0_26 = arith.constant 0 : index
    %47 = vector.load %arg4[%c0_24, %c0_25, %c0_26] : memref<9x8x8xf32, #tpu.memory_space<vmem>>, vector<1x8x8xf32>
    %48 = vector.shape_cast %47 : vector<1x8x8xf32> to vector<8x8xf32>
    %cst_27 = arith.constant dense<0.000000e+00> : vector<8x256xf32>
    %49 = tpu.matmul %48, %44, %cst_27 {dimension_numbers = #tpu.dot_dimension_numbers<[1], [0], [0], [1], [0, 0, 1, 1], [], []>} : vector<8x8xf32>, vector<8x256xf32>, vector<8x256xf32> -> vector<8x256xf32>
    %50 = arith.addf %38, %49 : vector<8x256xf32>
    %c0_28 = arith.constant 0 : index
    %c0_29 = arith.constant 0 : index
    %c0_30 = arith.constant 0 : index
    %51 = vector.load %arg5[%c0_28, %c0_29, %c0_30] : memref<9x8x8xf32, #tpu.memory_space<vmem>>, vector<1x8x8xf32>
    %52 = vector.shape_cast %51 : vector<1x8x8xf32> to vector<8x8xf32>
    %cst_31 = arith.constant dense<0.000000e+00> : vector<8x256xf32>
    %53 = tpu.matmul %52, %46, %cst_31 {dimension_numbers = #tpu.dot_dimension_numbers<[1], [0], [0], [1], [0, 0, 1, 1], [], []>} : vector<8x8xf32>, vector<8x256xf32>, vector<8x256xf32> -> vector<8x256xf32>
    %54 = arith.addf %50, %53 : vector<8x256xf32>
    %c0_32 = arith.constant 0 : index
    %c0_33 = arith.constant 0 : index
    %c112 = arith.constant 112 : index
    %55 = vector.load %arg12[%c0_32, %c0_33, %c112] : memref<2x8x512xf32, #tpu.memory_space<vmem>>, vector<1x8x256xf32>
    %56 = vector.shape_cast %55 : vector<1x8x256xf32> to vector<8x256xf32>
    %c1_34 = arith.constant 1 : index
    %c0_35 = arith.constant 0 : index
    %c112_36 = arith.constant 112 : index
    %57 = vector.load %arg12[%c1_34, %c0_35, %c112_36] : memref<2x8x512xf32, #tpu.memory_space<vmem>>, vector<1x8x256xf32>
    %58 = vector.shape_cast %57 : vector<1x8x256xf32> to vector<8x256xf32>
    %c1_37 = arith.constant 1 : index
    %c0_38 = arith.constant 0 : index
    %c0_39 = arith.constant 0 : index
    %59 = vector.load %arg4[%c1_37, %c0_38, %c0_39] : memref<9x8x8xf32, #tpu.memory_space<vmem>>, vector<1x8x8xf32>
    %60 = vector.shape_cast %59 : vector<1x8x8xf32> to vector<8x8xf32>
    %cst_40 = arith.constant dense<0.000000e+00> : vector<8x256xf32>
    %61 = tpu.matmul %60, %56, %cst_40 {dimension_numbers = #tpu.dot_dimension_numbers<[1], [0], [0], [1], [0, 0, 1, 1], [], []>} : vector<8x8xf32>, vector<8x256xf32>, vector<8x256xf32> -> vector<8x256xf32>
    %62 = arith.addf %54, %61 : vector<8x256xf32>
    %c1_41 = arith.constant 1 : index
    %c0_42 = arith.constant 0 : index
    %c0_43 = arith.constant 0 : index
    %63 = vector.load %arg5[%c1_41, %c0_42, %c0_43] : memref<9x8x8xf32, #tpu.memory_space<vmem>>, vector<1x8x8xf32>
    %64 = vector.shape_cast %63 : vector<1x8x8xf32> to vector<8x8xf32>
    %cst_44 = arith.constant dense<0.000000e+00> : vector<8x256xf32>
    %65 = tpu.matmul %64, %58, %cst_44 {dimension_numbers = #tpu.dot_dimension_numbers<[1], [0], [0], [1], [0, 0, 1, 1], [], []>} : vector<8x8xf32>, vector<8x256xf32>, vector<8x256xf32> -> vector<8x256xf32>
    %66 = arith.addf %62, %65 : vector<8x256xf32>
    %c0_45 = arith.constant 0 : index
    %c0_46 = arith.constant 0 : index
    %c113 = arith.constant 113 : index
    %67 = vector.load %arg12[%c0_45, %c0_46, %c113] : memref<2x8x512xf32, #tpu.memory_space<vmem>>, vector<1x8x256xf32>
    %68 = vector.shape_cast %67 : vector<1x8x256xf32> to vector<8x256xf32>
    %c1_47 = arith.constant 1 : index
    %c0_48 = arith.constant 0 : index
    %c113_49 = arith.constant 113 : index
    %69 = vector.load %arg12[%c1_47, %c0_48, %c113_49] : memref<2x8x512xf32, #tpu.memory_space<vmem>>, vector<1x8x256xf32>
    %70 = vector.shape_cast %69 : vector<1x8x256xf32> to vector<8x256xf32>
    %71 = vector.broadcast %24 : vector<1x256xf32> to vector<8x256xf32>
    %72 = arith.mulf %68, %71 : vector<8x256xf32>
    %73 = vector.broadcast %24 : vector<1x256xf32> to vector<8x256xf32>
    %74 = arith.mulf %70, %73 : vector<8x256xf32>
    %c2 = arith.constant 2 : index
    %c0_50 = arith.constant 0 : index
    %c0_51 = arith.constant 0 : index
    %75 = vector.load %arg4[%c2, %c0_50, %c0_51] : memref<9x8x8xf32, #tpu.memory_space<vmem>>, vector<1x8x8xf32>
    %76 = vector.shape_cast %75 : vector<1x8x8xf32> to vector<8x8xf32>
    %cst_52 = arith.constant dense<0.000000e+00> : vector<8x256xf32>
    %77 = tpu.matmul %76, %72, %cst_52 {dimension_numbers = #tpu.dot_dimension_numbers<[1], [0], [0], [1], [0, 0, 1, 1], [], []>} : vector<8x8xf32>, vector<8x256xf32>, vector<8x256xf32> -> vector<8x256xf32>
    %78 = arith.addf %66, %77 : vector<8x256xf32>
    %c2_53 = arith.constant 2 : index
    %c0_54 = arith.constant 0 : index
    %c0_55 = arith.constant 0 : index
    %79 = vector.load %arg5[%c2_53, %c0_54, %c0_55] : memref<9x8x8xf32, #tpu.memory_space<vmem>>, vector<1x8x8xf32>
    %80 = vector.shape_cast %79 : vector<1x8x8xf32> to vector<8x8xf32>
    %cst_56 = arith.constant dense<0.000000e+00> : vector<8x256xf32>
    %81 = tpu.matmul %80, %74, %cst_56 {dimension_numbers = #tpu.dot_dimension_numbers<[1], [0], [0], [1], [0, 0, 1, 1], [], []>} : vector<8x8xf32>, vector<8x256xf32>, vector<8x256xf32> -> vector<8x256xf32>
    %82 = arith.addf %78, %81 : vector<8x256xf32>
    %c0_57 = arith.constant 0 : index
    %c0_58 = arith.constant 0 : index
    %c127 = arith.constant 127 : index
    %83 = vector.load %arg12[%c0_57, %c0_58, %c127] : memref<2x8x512xf32, #tpu.memory_space<vmem>>, vector<1x8x256xf32>
    %84 = vector.shape_cast %83 : vector<1x8x256xf32> to vector<8x256xf32>
    %c1_59 = arith.constant 1 : index
    %c0_60 = arith.constant 0 : index
    %c127_61 = arith.constant 127 : index
    %85 = vector.load %arg12[%c1_59, %c0_60, %c127_61] : memref<2x8x512xf32, #tpu.memory_space<vmem>>, vector<1x8x256xf32>
    %86 = vector.shape_cast %85 : vector<1x8x256xf32> to vector<8x256xf32>
    %87 = vector.broadcast %20 : vector<1x256xf32> to vector<8x256xf32>
    %88 = arith.mulf %84, %87 : vector<8x256xf32>
    %89 = vector.broadcast %20 : vector<1x256xf32> to vector<8x256xf32>
    %90 = arith.mulf %86, %89 : vector<8x256xf32>
    %c3 = arith.constant 3 : index
    %c0_62 = arith.constant 0 : index
    %c0_63 = arith.constant 0 : index
    %91 = vector.load %arg4[%c3, %c0_62, %c0_63] : memref<9x8x8xf32, #tpu.memory_space<vmem>>, vector<1x8x8xf32>
    %92 = vector.shape_cast %91 : vector<1x8x8xf32> to vector<8x8xf32>
    %cst_64 = arith.constant dense<0.000000e+00> : vector<8x256xf32>
    %93 = tpu.matmul %92, %88, %cst_64 {dimension_numbers = #tpu.dot_dimension_numbers<[1], [0], [0], [1], [0, 0, 1, 1], [], []>} : vector<8x8xf32>, vector<8x256xf32>, vector<8x256xf32> -> vector<8x256xf32>
    %94 = arith.addf %82, %93 : vector<8x256xf32>
    %c3_65 = arith.constant 3 : index
    %c0_66 = arith.constant 0 : index
    %c0_67 = arith.constant 0 : index
    %95 = vector.load %arg5[%c3_65, %c0_66, %c0_67] : memref<9x8x8xf32, #tpu.memory_space<vmem>>, vector<1x8x8xf32>
    %96 = vector.shape_cast %95 : vector<1x8x8xf32> to vector<8x8xf32>
    %cst_68 = arith.constant dense<0.000000e+00> : vector<8x256xf32>
    %97 = tpu.matmul %96, %90, %cst_68 {dimension_numbers = #tpu.dot_dimension_numbers<[1], [0], [0], [1], [0, 0, 1, 1], [], []>} : vector<8x8xf32>, vector<8x256xf32>, vector<8x256xf32> -> vector<8x256xf32>
    %98 = arith.addf %94, %97 : vector<8x256xf32>
    %c0_69 = arith.constant 0 : index
    %c0_70 = arith.constant 0 : index
    %c128_71 = arith.constant 128 : index
    %99 = vector.load %arg12[%c0_69, %c0_70, %c128_71] : memref<2x8x512xf32, #tpu.memory_space<vmem>>, vector<1x8x256xf32>
    %100 = vector.shape_cast %99 : vector<1x8x256xf32> to vector<8x256xf32>
    %c1_72 = arith.constant 1 : index
    %c0_73 = arith.constant 0 : index
    %c128_74 = arith.constant 128 : index
    %101 = vector.load %arg12[%c1_72, %c0_73, %c128_74] : memref<2x8x512xf32, #tpu.memory_space<vmem>>, vector<1x8x256xf32>
    %102 = vector.shape_cast %101 : vector<1x8x256xf32> to vector<8x256xf32>
    %c4 = arith.constant 4 : index
    %c0_75 = arith.constant 0 : index
    %c0_76 = arith.constant 0 : index
    %103 = vector.load %arg4[%c4, %c0_75, %c0_76] : memref<9x8x8xf32, #tpu.memory_space<vmem>>, vector<1x8x8xf32>
    %104 = vector.shape_cast %103 : vector<1x8x8xf32> to vector<8x8xf32>
    %cst_77 = arith.constant dense<0.000000e+00> : vector<8x256xf32>
    %105 = tpu.matmul %104, %100, %cst_77 {dimension_numbers = #tpu.dot_dimension_numbers<[1], [0], [0], [1], [0, 0, 1, 1], [], []>} : vector<8x8xf32>, vector<8x256xf32>, vector<8x256xf32> -> vector<8x256xf32>
    %106 = arith.addf %98, %105 : vector<8x256xf32>
    %c4_78 = arith.constant 4 : index
    %c0_79 = arith.constant 0 : index
    %c0_80 = arith.constant 0 : index
    %107 = vector.load %arg5[%c4_78, %c0_79, %c0_80] : memref<9x8x8xf32, #tpu.memory_space<vmem>>, vector<1x8x8xf32>
    %108 = vector.shape_cast %107 : vector<1x8x8xf32> to vector<8x8xf32>
    %cst_81 = arith.constant dense<0.000000e+00> : vector<8x256xf32>
    %109 = tpu.matmul %108, %102, %cst_81 {dimension_numbers = #tpu.dot_dimension_numbers<[1], [0], [0], [1], [0, 0, 1, 1], [], []>} : vector<8x8xf32>, vector<8x256xf32>, vector<8x256xf32> -> vector<8x256xf32>
    %110 = arith.addf %106, %109 : vector<8x256xf32>
    %c0_82 = arith.constant 0 : index
    %c0_83 = arith.constant 0 : index
    %c129 = arith.constant 129 : index
    %111 = vector.load %arg12[%c0_82, %c0_83, %c129] : memref<2x8x512xf32, #tpu.memory_space<vmem>>, vector<1x8x256xf32>
    %112 = vector.shape_cast %111 : vector<1x8x256xf32> to vector<8x256xf32>
    %c1_84 = arith.constant 1 : index
    %c0_85 = arith.constant 0 : index
    %c129_86 = arith.constant 129 : index
    %113 = vector.load %arg12[%c1_84, %c0_85, %c129_86] : memref<2x8x512xf32, #tpu.memory_space<vmem>>, vector<1x8x256xf32>
    %114 = vector.shape_cast %113 : vector<1x8x256xf32> to vector<8x256xf32>
    %115 = vector.broadcast %24 : vector<1x256xf32> to vector<8x256xf32>
    %116 = arith.mulf %112, %115 : vector<8x256xf32>
    %117 = vector.broadcast %24 : vector<1x256xf32> to vector<8x256xf32>
    %118 = arith.mulf %114, %117 : vector<8x256xf32>
    %c5 = arith.constant 5 : index
    %c0_87 = arith.constant 0 : index
    %c0_88 = arith.constant 0 : index
    %119 = vector.load %arg4[%c5, %c0_87, %c0_88] : memref<9x8x8xf32, #tpu.memory_space<vmem>>, vector<1x8x8xf32>
    %120 = vector.shape_cast %119 : vector<1x8x8xf32> to vector<8x8xf32>
    %cst_89 = arith.constant dense<0.000000e+00> : vector<8x256xf32>
    %121 = tpu.matmul %120, %116, %cst_89 {dimension_numbers = #tpu.dot_dimension_numbers<[1], [0], [0], [1], [0, 0, 1, 1], [], []>} : vector<8x8xf32>, vector<8x256xf32>, vector<8x256xf32> -> vector<8x256xf32>
    %122 = arith.addf %110, %121 : vector<8x256xf32>
    %c5_90 = arith.constant 5 : index
    %c0_91 = arith.constant 0 : index
    %c0_92 = arith.constant 0 : index
    %123 = vector.load %arg5[%c5_90, %c0_91, %c0_92] : memref<9x8x8xf32, #tpu.memory_space<vmem>>, vector<1x8x8xf32>
    %124 = vector.shape_cast %123 : vector<1x8x8xf32> to vector<8x8xf32>
    %cst_93 = arith.constant dense<0.000000e+00> : vector<8x256xf32>
    %125 = tpu.matmul %124, %118, %cst_93 {dimension_numbers = #tpu.dot_dimension_numbers<[1], [0], [0], [1], [0, 0, 1, 1], [], []>} : vector<8x8xf32>, vector<8x256xf32>, vector<8x256xf32> -> vector<8x256xf32>
    %126 = arith.addf %122, %125 : vector<8x256xf32>
    %c0_94 = arith.constant 0 : index
    %c0_95 = arith.constant 0 : index
    %c143 = arith.constant 143 : index
    %127 = vector.load %arg12[%c0_94, %c0_95, %c143] : memref<2x8x512xf32, #tpu.memory_space<vmem>>, vector<1x8x256xf32>
    %128 = vector.shape_cast %127 : vector<1x8x256xf32> to vector<8x256xf32>
    %c1_96 = arith.constant 1 : index
    %c0_97 = arith.constant 0 : index
    %c143_98 = arith.constant 143 : index
    %129 = vector.load %arg12[%c1_96, %c0_97, %c143_98] : memref<2x8x512xf32, #tpu.memory_space<vmem>>, vector<1x8x256xf32>
    %130 = vector.shape_cast %129 : vector<1x8x256xf32> to vector<8x256xf32>
    %131 = vector.broadcast %20 : vector<1x256xf32> to vector<8x256xf32>
    %132 = arith.mulf %128, %131 : vector<8x256xf32>
    %133 = vector.broadcast %20 : vector<1x256xf32> to vector<8x256xf32>
    %134 = arith.mulf %130, %133 : vector<8x256xf32>
    %c6 = arith.constant 6 : index
    %c0_99 = arith.constant 0 : index
    %c0_100 = arith.constant 0 : index
    %135 = vector.load %arg4[%c6, %c0_99, %c0_100] : memref<9x8x8xf32, #tpu.memory_space<vmem>>, vector<1x8x8xf32>
    %136 = vector.shape_cast %135 : vector<1x8x8xf32> to vector<8x8xf32>
    %cst_101 = arith.constant dense<0.000000e+00> : vector<8x256xf32>
    %137 = tpu.matmul %136, %132, %cst_101 {dimension_numbers = #tpu.dot_dimension_numbers<[1], [0], [0], [1], [0, 0, 1, 1], [], []>} : vector<8x8xf32>, vector<8x256xf32>, vector<8x256xf32> -> vector<8x256xf32>
    %138 = arith.addf %126, %137 : vector<8x256xf32>
    %c6_102 = arith.constant 6 : index
    %c0_103 = arith.constant 0 : index
    %c0_104 = arith.constant 0 : index
    %139 = vector.load %arg5[%c6_102, %c0_103, %c0_104] : memref<9x8x8xf32, #tpu.memory_space<vmem>>, vector<1x8x8xf32>
    %140 = vector.shape_cast %139 : vector<1x8x8xf32> to vector<8x8xf32>
    %cst_105 = arith.constant dense<0.000000e+00> : vector<8x256xf32>
    %141 = tpu.matmul %140, %134, %cst_105 {dimension_numbers = #tpu.dot_dimension_numbers<[1], [0], [0], [1], [0, 0, 1, 1], [], []>} : vector<8x8xf32>, vector<8x256xf32>, vector<8x256xf32> -> vector<8x256xf32>
    %142 = arith.addf %138, %141 : vector<8x256xf32>
    %c0_106 = arith.constant 0 : index
    %c0_107 = arith.constant 0 : index
    %c144 = arith.constant 144 : index
    %143 = vector.load %arg12[%c0_106, %c0_107, %c144] : memref<2x8x512xf32, #tpu.memory_space<vmem>>, vector<1x8x256xf32>
    %144 = vector.shape_cast %143 : vector<1x8x256xf32> to vector<8x256xf32>
    %c1_108 = arith.constant 1 : index
    %c0_109 = arith.constant 0 : index
    %c144_110 = arith.constant 144 : index
    %145 = vector.load %arg12[%c1_108, %c0_109, %c144_110] : memref<2x8x512xf32, #tpu.memory_space<vmem>>, vector<1x8x256xf32>
    %146 = vector.shape_cast %145 : vector<1x8x256xf32> to vector<8x256xf32>
    %c7 = arith.constant 7 : index
    %c0_111 = arith.constant 0 : index
    %c0_112 = arith.constant 0 : index
    %147 = vector.load %arg4[%c7, %c0_111, %c0_112] : memref<9x8x8xf32, #tpu.memory_space<vmem>>, vector<1x8x8xf32>
    %148 = vector.shape_cast %147 : vector<1x8x8xf32> to vector<8x8xf32>
    %cst_113 = arith.constant dense<0.000000e+00> : vector<8x256xf32>
    %149 = tpu.matmul %148, %144, %cst_113 {dimension_numbers = #tpu.dot_dimension_numbers<[1], [0], [0], [1], [0, 0, 1, 1], [], []>} : vector<8x8xf32>, vector<8x256xf32>, vector<8x256xf32> -> vector<8x256xf32>
    %150 = arith.addf %142, %149 : vector<8x256xf32>
    %c7_114 = arith.constant 7 : index
    %c0_115 = arith.constant 0 : index
    %c0_116 = arith.constant 0 : index
    %151 = vector.load %arg5[%c7_114, %c0_115, %c0_116] : memref<9x8x8xf32, #tpu.memory_space<vmem>>, vector<1x8x8xf32>
    %152 = vector.shape_cast %151 : vector<1x8x8xf32> to vector<8x8xf32>
    %cst_117 = arith.constant dense<0.000000e+00> : vector<8x256xf32>
    %153 = tpu.matmul %152, %146, %cst_117 {dimension_numbers = #tpu.dot_dimension_numbers<[1], [0], [0], [1], [0, 0, 1, 1], [], []>} : vector<8x8xf32>, vector<8x256xf32>, vector<8x256xf32> -> vector<8x256xf32>
    %154 = arith.addf %150, %153 : vector<8x256xf32>
    %c0_118 = arith.constant 0 : index
    %c0_119 = arith.constant 0 : index
    %c145 = arith.constant 145 : index
    %155 = vector.load %arg12[%c0_118, %c0_119, %c145] : memref<2x8x512xf32, #tpu.memory_space<vmem>>, vector<1x8x256xf32>
    %156 = vector.shape_cast %155 : vector<1x8x256xf32> to vector<8x256xf32>
    %c1_120 = arith.constant 1 : index
    %c0_121 = arith.constant 0 : index
    %c145_122 = arith.constant 145 : index
    %157 = vector.load %arg12[%c1_120, %c0_121, %c145_122] : memref<2x8x512xf32, #tpu.memory_space<vmem>>, vector<1x8x256xf32>
    %158 = vector.shape_cast %157 : vector<1x8x256xf32> to vector<8x256xf32>
    %159 = vector.broadcast %24 : vector<1x256xf32> to vector<8x256xf32>
    %160 = arith.mulf %156, %159 : vector<8x256xf32>
    %161 = vector.broadcast %24 : vector<1x256xf32> to vector<8x256xf32>
    %162 = arith.mulf %158, %161 : vector<8x256xf32>
    %c8 = arith.constant 8 : index
    %c0_123 = arith.constant 0 : index
    %c0_124 = arith.constant 0 : index
    %163 = vector.load %arg4[%c8, %c0_123, %c0_124] : memref<9x8x8xf32, #tpu.memory_space<vmem>>, vector<1x8x8xf32>
    %164 = vector.shape_cast %163 : vector<1x8x8xf32> to vector<8x8xf32>
    %cst_125 = arith.constant dense<0.000000e+00> : vector<8x256xf32>
    %165 = tpu.matmul %164, %160, %cst_125 {dimension_numbers = #tpu.dot_dimension_numbers<[1], [0], [0], [1], [0, 0, 1, 1], [], []>} : vector<8x8xf32>, vector<8x256xf32>, vector<8x256xf32> -> vector<8x256xf32>
    %166 = arith.addf %154, %165 : vector<8x256xf32>
    %c8_126 = arith.constant 8 : index
    %c0_127 = arith.constant 0 : index
    %c0_128 = arith.constant 0 : index
    %167 = vector.load %arg5[%c8_126, %c0_127, %c0_128] : memref<9x8x8xf32, #tpu.memory_space<vmem>>, vector<1x8x8xf32>
    %168 = vector.shape_cast %167 : vector<1x8x8xf32> to vector<8x8xf32>
    %cst_129 = arith.constant dense<0.000000e+00> : vector<8x256xf32>
    %169 = tpu.matmul %168, %162, %cst_129 {dimension_numbers = #tpu.dot_dimension_numbers<[1], [0], [0], [1], [0, 0, 1, 1], [], []>} : vector<8x8xf32>, vector<8x256xf32>, vector<8x256xf32> -> vector<8x256xf32>
    %170 = arith.addf %166, %169 : vector<8x256xf32>
    %c0_130 = arith.constant 0 : index
    %c0_131 = arith.constant 0 : index
    %171 = vector.load %arg6[%c0_130, %c0_131] : memref<8x1xf32, #tpu.memory_space<vmem>>, vector<8x1xf32>
    %172 = vector.broadcast %171 : vector<8x1xf32> to vector<8x256xf32>
    %173 = arith.addf %170, %172 : vector<8x256xf32>
    %cst_132 = arith.constant 0.000000e+00 : f32
    %174 = vector.broadcast %cst_132 : f32 to vector<8x256xf32>
    %175 = arith.maximumf %173, %174 : vector<8x256xf32>
    %c0_133 = arith.constant 0 : index
    %c0_134 = arith.constant 0 : index
    %c0_135 = arith.constant 0 : index
    %176 = vector.load %arg3[%c0_133, %c0_134, %c0_135] : memref<2x1x256xf32, #tpu.memory_space<vmem>>, vector<1x1x256xf32>
    %177 = vector.shape_cast %176 : vector<1x1x256xf32> to vector<1x256xf32>
    %178 = vector.broadcast %177 : vector<1x256xf32> to vector<8x256xf32>
    %179 = arith.mulf %175, %178 : vector<8x256xf32>
    %c0_136 = arith.constant 0 : index
    %c0_137 = arith.constant 0 : index
    %180 = vector.load %arg7[%c0_136, %c0_137] : memref<2x8xf32, #tpu.memory_space<vmem>>, vector<2x8xf32>
    %cst_138 = arith.constant dense<0.000000e+00> : vector<2x256xf32>
    %181 = tpu.matmul %180, %179, %cst_138 {dimension_numbers = #tpu.dot_dimension_numbers<[1], [0], [0], [1], [0, 0, 1, 1], [], []>} : vector<2x8xf32>, vector<8x256xf32>, vector<2x256xf32> -> vector<2x256xf32>
    %c0_139 = arith.constant 0 : index
    %c0_140 = arith.constant 0 : index
    %182 = vector.load %arg8[%c0_139, %c0_140] : memref<2x1xf32, #tpu.memory_space<vmem>>, vector<2x1xf32>
    %183 = vector.broadcast %182 : vector<2x1xf32> to vector<2x256xf32>
    %184 = arith.addf %181, %183 : vector<2x256xf32>
    %cst_141 = arith.constant 0.000000e+00 : f32
    %185 = vector.broadcast %cst_141 : f32 to vector<2x256xf32>
    %186 = arith.maximumf %184, %185 : vector<2x256xf32>
    %c0_142 = arith.constant 0 : index
    %c0_143 = arith.constant 0 : index
    %187 = vector.load %arg9[%c0_142, %c0_143] : memref<8x2xf32, #tpu.memory_space<vmem>>, vector<8x2xf32>
    %cst_144 = arith.constant dense<0.000000e+00> : vector<8x256xf32>
    %188 = tpu.matmul %187, %186, %cst_144 {dimension_numbers = #tpu.dot_dimension_numbers<[1], [0], [0], [1], [0, 0, 1, 1], [], []>} : vector<8x2xf32>, vector<2x256xf32>, vector<8x256xf32> -> vector<8x256xf32>
    %c0_145 = arith.constant 0 : index
    %c0_146 = arith.constant 0 : index
    %189 = vector.load %arg10[%c0_145, %c0_146] : memref<8x1xf32, #tpu.memory_space<vmem>>, vector<8x1xf32>
    %190 = vector.broadcast %189 : vector<8x1xf32> to vector<8x256xf32>
    %191 = arith.addf %188, %190 : vector<8x256xf32>
    %192 = arith.negf %191 : vector<8x256xf32>
    %193 = math.exp %192 : vector<8x256xf32>
    %cst_147 = arith.constant 1.000000e+00 : f32
    %194 = vector.broadcast %cst_147 : f32 to vector<8x256xf32>
    %195 = arith.addf %194, %193 : vector<8x256xf32>
    %196 = arith.divf %194, %195 : vector<8x256xf32>
    %197 = arith.mulf %196, %179 : vector<8x256xf32>
    %c0_148 = arith.constant 0 : index
    %c0_149 = arith.constant 0 : index
    %c0_150 = arith.constant 0 : index
    %198 = vector.load %arg1[%c0_148, %c0_149, %c0_150] : memref<2x8x256xf32, #tpu.memory_space<vmem>>, vector<1x8x256xf32>
    %199 = vector.shape_cast %198 : vector<1x8x256xf32> to vector<8x256xf32>
    %200 = arith.addf %197, %199 : vector<8x256xf32>
    %c0_151 = arith.constant 0 : index
    %c0_152 = arith.constant 0 : index
    %c0_153 = arith.constant 0 : index
    %201 = vector.load %arg11[%c0_151, %c0_152, %c0_153] : memref<2x8x256xf32, #tpu.memory_space<vmem>>, vector<1x8x256xf32>
    %202 = vector.shape_cast %201 : vector<1x8x256xf32> to vector<8x256xf32>
    %203 = vector.shape_cast %200 : vector<8x256xf32> to vector<1x8x256xf32>
    tpu.vector_store %arg11[%c0_151, %c0_152, %c0_153], %203 {strides = array<i32>} : memref<2x8x256xf32, #tpu.memory_space<vmem>>, vector<1x8x256xf32>,
    %c1_154 = arith.constant 1 : index
    %c0_155 = arith.constant 0 : index
    %c0_156 = arith.constant 0 : index
    %204 = vector.load %arg1[%c1_154, %c0_155, %c0_156] : memref<2x8x256xf32, #tpu.memory_space<vmem>>, vector<1x8x256xf32>
    %205 = vector.shape_cast %204 : vector<1x8x256xf32> to vector<8x256xf32>
    %c0_157 = arith.constant 0 : index
    %c0_158 = arith.constant 0 : index
    %c128_159 = arith.constant 128 : index
    %206 = vector.load %arg12[%c0_157, %c0_158, %c128_159] : memref<2x8x512xf32, #tpu.memory_space<vmem>>, vector<1x8x256xf32>
    %207 = vector.shape_cast %206 : vector<1x8x256xf32> to vector<8x256xf32>
    %208 = vector.shape_cast %205 : vector<8x256xf32> to vector<1x8x256xf32>
    tpu.vector_store %arg12[%c0_157, %c0_158, %c128_159], %208 {strides = array<i32>} : memref<2x8x512xf32, #tpu.memory_space<vmem>>, vector<1x8x256xf32>,
    %c1_160 = arith.constant 1 : index
    %c0_161 = arith.constant 0 : index
    %c0_162 = arith.constant 0 : index
    %209 = vector.load %arg2[%c1_160, %c0_161, %c0_162] : memref<2x8x256xf32, #tpu.memory_space<vmem>>, vector<1x8x256xf32>
    %210 = vector.shape_cast %209 : vector<1x8x256xf32> to vector<8x256xf32>
    %c1_163 = arith.constant 1 : index
    %c0_164 = arith.constant 0 : index
    %c128_165 = arith.constant 128 : index
    %211 = vector.load %arg12[%c1_163, %c0_164, %c128_165] : memref<2x8x512xf32, #tpu.memory_space<vmem>>, vector<1x8x256xf32>
    %212 = vector.shape_cast %211 : vector<1x8x256xf32> to vector<8x256xf32>
    %213 = vector.shape_cast %210 : vector<8x256xf32> to vector<1x8x256xf32>
    tpu.vector_store %arg12[%c1_163, %c0_164, %c128_165], %213 {strides = array<i32>} : memref<2x8x512xf32, #tpu.memory_space<vmem>>, vector<1x8x256xf32>,
    %cst_166 = arith.constant 0.000000e+00 : f32
    %214 = vector.broadcast %cst_166 : f32 to vector<8x256xf32>
    %c0_167 = arith.constant 0 : index
    %c0_168 = arith.constant 0 : index
    %c111_169 = arith.constant 111 : index
    %215 = vector.load %arg12[%c0_167, %c0_168, %c111_169] : memref<2x8x512xf32, #tpu.memory_space<vmem>>, vector<1x8x256xf32>
    %216 = vector.shape_cast %215 : vector<1x8x256xf32> to vector<8x256xf32>
    %c1_170 = arith.constant 1 : index
    %c0_171 = arith.constant 0 : index
    %c111_172 = arith.constant 111 : index
    %217 = vector.load %arg12[%c1_170, %c0_171, %c111_172] : memref<2x8x512xf32, #tpu.memory_space<vmem>>, vector<1x8x256xf32>
    %218 = vector.shape_cast %217 : vector<1x8x256xf32> to vector<8x256xf32>
    %219 = vector.broadcast %20 : vector<1x256xf32> to vector<8x256xf32>
    %220 = arith.mulf %216, %219 : vector<8x256xf32>
    %221 = vector.broadcast %20 : vector<1x256xf32> to vector<8x256xf32>
    %222 = arith.mulf %218, %221 : vector<8x256xf32>
    %c0_173 = arith.constant 0 : index
    %c0_174 = arith.constant 0 : index
    %c0_175 = arith.constant 0 : index
    %223 = vector.load %arg4[%c0_173, %c0_174, %c0_175] : memref<9x8x8xf32, #tpu.memory_space<vmem>>, vector<1x8x8xf32>
    %224 = vector.shape_cast %223 : vector<1x8x8xf32> to vector<8x8xf32>
    %cst_176 = arith.constant dense<0.000000e+00> : vector<8x256xf32>
    %225 = tpu.matmul %224, %220, %cst_176 {dimension_numbers = #tpu.dot_dimension_numbers<[1], [0], [0], [1], [0, 0, 1, 1], [], []>} : vector<8x8xf32>, vector<8x256xf32>, vector<8x256xf32> -> vector<8x256xf32>
    %226 = arith.addf %214, %225 : vector<8x256xf32>
    %c0_177 = arith.constant 0 : index
    %c0_178 = arith.constant 0 : index
    %c0_179 = arith.constant 0 : index
    %227 = vector.load %arg5[%c0_177, %c0_178, %c0_179] : memref<9x8x8xf32, #tpu.memory_space<vmem>>, vector<1x8x8xf32>
    %228 = vector.shape_cast %227 : vector<1x8x8xf32> to vector<8x8xf32>
    %cst_180 = arith.constant dense<0.000000e+00> : vector<8x256xf32>
    %229 = tpu.matmul %228, %222, %cst_180 {dimension_numbers = #tpu.dot_dimension_numbers<[1], [0], [0], [1], [0, 0, 1, 1], [], []>} : vector<8x8xf32>, vector<8x256xf32>, vector<8x256xf32> -> vector<8x256xf32>
    %230 = arith.addf %226, %229 : vector<8x256xf32>
    %c0_181 = arith.constant 0 : index
    %c0_182 = arith.constant 0 : index
    %c112_183 = arith.constant 112 : index
    %231 = vector.load %arg12[%c0_181, %c0_182, %c112_183] : memref<2x8x512xf32, #tpu.memory_space<vmem>>, vector<1x8x256xf32>
    %232 = vector.shape_cast %231 : vector<1x8x256xf32> to vector<8x256xf32>
    %c1_184 = arith.constant 1 : index
    %c0_185 = arith.constant 0 : index
    %c112_186 = arith.constant 112 : index
    %233 = vector.load %arg12[%c1_184, %c0_185, %c112_186] : memref<2x8x512xf32, #tpu.memory_space<vmem>>, vector<1x8x256xf32>
    %234 = vector.shape_cast %233 : vector<1x8x256xf32> to vector<8x256xf32>
    %c1_187 = arith.constant 1 : index
    %c0_188 = arith.constant 0 : index
    %c0_189 = arith.constant 0 : index
    %235 = vector.load %arg4[%c1_187, %c0_188, %c0_189] : memref<9x8x8xf32, #tpu.memory_space<vmem>>, vector<1x8x8xf32>
    %236 = vector.shape_cast %235 : vector<1x8x8xf32> to vector<8x8xf32>
    %cst_190 = arith.constant dense<0.000000e+00> : vector<8x256xf32>
    %237 = tpu.matmul %236, %232, %cst_190 {dimension_numbers = #tpu.dot_dimension_numbers<[1], [0], [0], [1], [0, 0, 1, 1], [], []>} : vector<8x8xf32>, vector<8x256xf32>, vector<8x256xf32> -> vector<8x256xf32>
    %238 = arith.addf %230, %237 : vector<8x256xf32>
    %c1_191 = arith.constant 1 : index
    %c0_192 = arith.constant 0 : index
    %c0_193 = arith.constant 0 : index
    %239 = vector.load %arg5[%c1_191, %c0_192, %c0_193] : memref<9x8x8xf32, #tpu.memory_space<vmem>>, vector<1x8x8xf32>
    %240 = vector.shape_cast %239 : vector<1x8x8xf32> to vector<8x8xf32>
    %cst_194 = arith.constant dense<0.000000e+00> : vector<8x256xf32>
    %241 = tpu.matmul %240, %234, %cst_194 {dimension_numbers = #tpu.dot_dimension_numbers<[1], [0], [0], [1], [0, 0, 1, 1], [], []>} : vector<8x8xf32>, vector<8x256xf32>, vector<8x256xf32> -> vector<8x256xf32>
    %242 = arith.addf %238, %241 : vector<8x256xf32>
    %c0_195 = arith.constant 0 : index
    %c0_196 = arith.constant 0 : index
    %c113_197 = arith.constant 113 : index
    %243 = vector.load %arg12[%c0_195, %c0_196, %c113_197] : memref<2x8x512xf32, #tpu.memory_space<vmem>>, vector<1x8x256xf32>
    %244 = vector.shape_cast %243 : vector<1x8x256xf32> to vector<8x256xf32>
    %c1_198 = arith.constant 1 : index
    %c0_199 = arith.constant 0 : index
    %c113_200 = arith.constant 113 : index
    %245 = vector.load %arg12[%c1_198, %c0_199, %c113_200] : memref<2x8x512xf32, #tpu.memory_space<vmem>>, vector<1x8x256xf32>
    %246 = vector.shape_cast %245 : vector<1x8x256xf32> to vector<8x256xf32>
    %247 = vector.broadcast %24 : vector<1x256xf32> to vector<8x256xf32>
    %248 = arith.mulf %244, %247 : vector<8x256xf32>
    %249 = vector.broadcast %24 : vector<1x256xf32> to vector<8x256xf32>
    %250 = arith.mulf %246, %249 : vector<8x256xf32>
    %c2_201 = arith.constant 2 : index
    %c0_202 = arith.constant 0 : index
    %c0_203 = arith.constant 0 : index
    %251 = vector.load %arg4[%c2_201, %c0_202, %c0_203] : memref<9x8x8xf32, #tpu.memory_space<vmem>>, vector<1x8x8xf32>
    %252 = vector.shape_cast %251 : vector<1x8x8xf32> to vector<8x8xf32>
    %cst_204 = arith.constant dense<0.000000e+00> : vector<8x256xf32>
    %253 = tpu.matmul %252, %248, %cst_204 {dimension_numbers = #tpu.dot_dimension_numbers<[1], [0], [0], [1], [0, 0, 1, 1], [], []>} : vector<8x8xf32>, vector<8x256xf32>, vector<8x256xf32> -> vector<8x256xf32>
    %254 = arith.addf %242, %253 : vector<8x256xf32>
    %c2_205 = arith.constant 2 : index
    %c0_206 = arith.constant 0 : index
    %c0_207 = arith.constant 0 : index
    %255 = vector.load %arg5[%c2_205, %c0_206, %c0_207] : memref<9x8x8xf32, #tpu.memory_space<vmem>>, vector<1x8x8xf32>
    %256 = vector.shape_cast %255 : vector<1x8x8xf32> to vector<8x8xf32>
    %cst_208 = arith.constant dense<0.000000e+00> : vector<8x256xf32>
    %257 = tpu.matmul %256, %250, %cst_208 {dimension_numbers = #tpu.dot_dimension_numbers<[1], [0], [0], [1], [0, 0, 1, 1], [], []>} : vector<8x8xf32>, vector<8x256xf32>, vector<8x256xf32> -> vector<8x256xf32>
    %258 = arith.addf %254, %257 : vector<8x256xf32>
    %c0_209 = arith.constant 0 : index
    %c0_210 = arith.constant 0 : index
    %c127_211 = arith.constant 127 : index
    %259 = vector.load %arg12[%c0_209, %c0_210, %c127_211] : memref<2x8x512xf32, #tpu.memory_space<vmem>>, vector<1x8x256xf32>
    %260 = vector.shape_cast %259 : vector<1x8x256xf32> to vector<8x256xf32>
    %c1_212 = arith.constant 1 : index
    %c0_213 = arith.constant 0 : index
    %c127_214 = arith.constant 127 : index
    %261 = vector.load %arg12[%c1_212, %c0_213, %c127_214] : memref<2x8x512xf32, #tpu.memory_space<vmem>>, vector<1x8x256xf32>
    %262 = vector.shape_cast %261 : vector<1x8x256xf32> to vector<8x256xf32>
    %263 = vector.broadcast %20 : vector<1x256xf32> to vector<8x256xf32>
    %264 = arith.mulf %260, %263 : vector<8x256xf32>
    %265 = vector.broadcast %20 : vector<1x256xf32> to vector<8x256xf32>
    %266 = arith.mulf %262, %265 : vector<8x256xf32>
    %c3_215 = arith.constant 3 : index
    %c0_216 = arith.constant 0 : index
    %c0_217 = arith.constant 0 : index
    %267 = vector.load %arg4[%c3_215, %c0_216, %c0_217] : memref<9x8x8xf32, #tpu.memory_space<vmem>>, vector<1x8x8xf32>
    %268 = vector.shape_cast %267 : vector<1x8x8xf32> to vector<8x8xf32>
    %cst_218 = arith.constant dense<0.000000e+00> : vector<8x256xf32>
    %269 = tpu.matmul %268, %264, %cst_218 {dimension_numbers = #tpu.dot_dimension_numbers<[1], [0], [0], [1], [0, 0, 1, 1], [], []>} : vector<8x8xf32>, vector<8x256xf32>, vector<8x256xf32> -> vector<8x256xf32>
    %270 = arith.addf %258, %269 : vector<8x256xf32>
    %c3_219 = arith.constant 3 : index
    %c0_220 = arith.constant 0 : index
    %c0_221 = arith.constant 0 : index
    %271 = vector.load %arg5[%c3_219, %c0_220, %c0_221] : memref<9x8x8xf32, #tpu.memory_space<vmem>>, vector<1x8x8xf32>
    %272 = vector.shape_cast %271 : vector<1x8x8xf32> to vector<8x8xf32>
    %cst_222 = arith.constant dense<0.000000e+00> : vector<8x256xf32>
    %273 = tpu.matmul %272, %266, %cst_222 {dimension_numbers = #tpu.dot_dimension_numbers<[1], [0], [0], [1], [0, 0, 1, 1], [], []>} : vector<8x8xf32>, vector<8x256xf32>, vector<8x256xf32> -> vector<8x256xf32>
    %274 = arith.addf %270, %273 : vector<8x256xf32>
    %c0_223 = arith.constant 0 : index
    %c0_224 = arith.constant 0 : index
    %c128_225 = arith.constant 128 : index
    %275 = vector.load %arg12[%c0_223, %c0_224, %c128_225] : memref<2x8x512xf32, #tpu.memory_space<vmem>>, vector<1x8x256xf32>
    %276 = vector.shape_cast %275 : vector<1x8x256xf32> to vector<8x256xf32>
    %c1_226 = arith.constant 1 : index
    %c0_227 = arith.constant 0 : index
    %c128_228 = arith.constant 128 : index
    %277 = vector.load %arg12[%c1_226, %c0_227, %c128_228] : memref<2x8x512xf32, #tpu.memory_space<vmem>>, vector<1x8x256xf32>
    %278 = vector.shape_cast %277 : vector<1x8x256xf32> to vector<8x256xf32>
    %c4_229 = arith.constant 4 : index
    %c0_230 = arith.constant 0 : index
    %c0_231 = arith.constant 0 : index
    %279 = vector.load %arg4[%c4_229, %c0_230, %c0_231] : memref<9x8x8xf32, #tpu.memory_space<vmem>>, vector<1x8x8xf32>
    %280 = vector.shape_cast %279 : vector<1x8x8xf32> to vector<8x8xf32>
    %cst_232 = arith.constant dense<0.000000e+00> : vector<8x256xf32>
    %281 = tpu.matmul %280, %276, %cst_232 {dimension_numbers = #tpu.dot_dimension_numbers<[1], [0], [0], [1], [0, 0, 1, 1], [], []>} : vector<8x8xf32>, vector<8x256xf32>, vector<8x256xf32> -> vector<8x256xf32>
    %282 = arith.addf %274, %281 : vector<8x256xf32>
    %c4_233 = arith.constant 4 : index
    %c0_234 = arith.constant 0 : index
    %c0_235 = arith.constant 0 : index
    %283 = vector.load %arg5[%c4_233, %c0_234, %c0_235] : memref<9x8x8xf32, #tpu.memory_space<vmem>>, vector<1x8x8xf32>
    %284 = vector.shape_cast %283 : vector<1x8x8xf32> to vector<8x8xf32>
    %cst_236 = arith.constant dense<0.000000e+00> : vector<8x256xf32>
    %285 = tpu.matmul %284, %278, %cst_236 {dimension_numbers = #tpu.dot_dimension_numbers<[1], [0], [0], [1], [0, 0, 1, 1], [], []>} : vector<8x8xf32>, vector<8x256xf32>, vector<8x256xf32> -> vector<8x256xf32>
    %286 = arith.addf %282, %285 : vector<8x256xf32>
    %c0_237 = arith.constant 0 : index
    %c0_238 = arith.constant 0 : index
    %c129_239 = arith.constant 129 : index
    %287 = vector.load %arg12[%c0_237, %c0_238, %c129_239] : memref<2x8x512xf32, #tpu.memory_space<vmem>>, vector<1x8x256xf32>
    %288 = vector.shape_cast %287 : vector<1x8x256xf32> to vector<8x256xf32>
    %c1_240 = arith.constant 1 : index
    %c0_241 = arith.constant 0 : index
    %c129_242 = arith.constant 129 : index
    %289 = vector.load %arg12[%c1_240, %c0_241, %c129_242] : memref<2x8x512xf32, #tpu.memory_space<vmem>>, vector<1x8x256xf32>
    %290 = vector.shape_cast %289 : vector<1x8x256xf32> to vector<8x256xf32>
    %291 = vector.broadcast %24 : vector<1x256xf32> to vector<8x256xf32>
    %292 = arith.mulf %288, %291 : vector<8x256xf32>
    %293 = vector.broadcast %24 : vector<1x256xf32> to vector<8x256xf32>
    %294 = arith.mulf %290, %293 : vector<8x256xf32>
    %c5_243 = arith.constant 5 : index
    %c0_244 = arith.constant 0 : index
    %c0_245 = arith.constant 0 : index
    %295 = vector.load %arg4[%c5_243, %c0_244, %c0_245] : memref<9x8x8xf32, #tpu.memory_space<vmem>>, vector<1x8x8xf32>
    %296 = vector.shape_cast %295 : vector<1x8x8xf32> to vector<8x8xf32>
    %cst_246 = arith.constant dense<0.000000e+00> : vector<8x256xf32>
    %297 = tpu.matmul %296, %292, %cst_246 {dimension_numbers = #tpu.dot_dimension_numbers<[1], [0], [0], [1], [0, 0, 1, 1], [], []>} : vector<8x8xf32>, vector<8x256xf32>, vector<8x256xf32> -> vector<8x256xf32>
    %298 = arith.addf %286, %297 : vector<8x256xf32>
    %c5_247 = arith.constant 5 : index
    %c0_248 = arith.constant 0 : index
    %c0_249 = arith.constant 0 : index
    %299 = vector.load %arg5[%c5_247, %c0_248, %c0_249] : memref<9x8x8xf32, #tpu.memory_space<vmem>>, vector<1x8x8xf32>
    %300 = vector.shape_cast %299 : vector<1x8x8xf32> to vector<8x8xf32>
    %cst_250 = arith.constant dense<0.000000e+00> : vector<8x256xf32>
    %301 = tpu.matmul %300, %294, %cst_250 {dimension_numbers = #tpu.dot_dimension_numbers<[1], [0], [0], [1], [0, 0, 1, 1], [], []>} : vector<8x8xf32>, vector<8x256xf32>, vector<8x256xf32> -> vector<8x256xf32>
    %302 = arith.addf %298, %301 : vector<8x256xf32>
    %c0_251 = arith.constant 0 : index
    %c0_252 = arith.constant 0 : index
    %c143_253 = arith.constant 143 : index
    %303 = vector.load %arg12[%c0_251, %c0_252, %c143_253] : memref<2x8x512xf32, #tpu.memory_space<vmem>>, vector<1x8x256xf32>
    %304 = vector.shape_cast %303 : vector<1x8x256xf32> to vector<8x256xf32>
    %c1_254 = arith.constant 1 : index
    %c0_255 = arith.constant 0 : index
    %c143_256 = arith.constant 143 : index
    %305 = vector.load %arg12[%c1_254, %c0_255, %c143_256] : memref<2x8x512xf32, #tpu.memory_space<vmem>>, vector<1x8x256xf32>
    %306 = vector.shape_cast %305 : vector<1x8x256xf32> to vector<8x256xf32>
    %307 = vector.broadcast %20 : vector<1x256xf32> to vector<8x256xf32>
    %308 = arith.mulf %304, %307 : vector<8x256xf32>
    %309 = vector.broadcast %20 : vector<1x256xf32> to vector<8x256xf32>
    %310 = arith.mulf %306, %309 : vector<8x256xf32>
    %c6_257 = arith.constant 6 : index
    %c0_258 = arith.constant 0 : index
    %c0_259 = arith.constant 0 : index
    %311 = vector.load %arg4[%c6_257, %c0_258, %c0_259] : memref<9x8x8xf32, #tpu.memory_space<vmem>>, vector<1x8x8xf32>
    %312 = vector.shape_cast %311 : vector<1x8x8xf32> to vector<8x8xf32>
    %cst_260 = arith.constant dense<0.000000e+00> : vector<8x256xf32>
    %313 = tpu.matmul %312, %308, %cst_260 {dimension_numbers = #tpu.dot_dimension_numbers<[1], [0], [0], [1], [0, 0, 1, 1], [], []>} : vector<8x8xf32>, vector<8x256xf32>, vector<8x256xf32> -> vector<8x256xf32>
    %314 = arith.addf %302, %313 : vector<8x256xf32>
    %c6_261 = arith.constant 6 : index
    %c0_262 = arith.constant 0 : index
    %c0_263 = arith.constant 0 : index
    %315 = vector.load %arg5[%c6_261, %c0_262, %c0_263] : memref<9x8x8xf32, #tpu.memory_space<vmem>>, vector<1x8x8xf32>
    %316 = vector.shape_cast %315 : vector<1x8x8xf32> to vector<8x8xf32>
    %cst_264 = arith.constant dense<0.000000e+00> : vector<8x256xf32>
    %317 = tpu.matmul %316, %310, %cst_264 {dimension_numbers = #tpu.dot_dimension_numbers<[1], [0], [0], [1], [0, 0, 1, 1], [], []>} : vector<8x8xf32>, vector<8x256xf32>, vector<8x256xf32> -> vector<8x256xf32>
    %318 = arith.addf %314, %317 : vector<8x256xf32>
    %c0_265 = arith.constant 0 : index
    %c0_266 = arith.constant 0 : index
    %c144_267 = arith.constant 144 : index
    %319 = vector.load %arg12[%c0_265, %c0_266, %c144_267] : memref<2x8x512xf32, #tpu.memory_space<vmem>>, vector<1x8x256xf32>
    %320 = vector.shape_cast %319 : vector<1x8x256xf32> to vector<8x256xf32>
    %c1_268 = arith.constant 1 : index
    %c0_269 = arith.constant 0 : index
    %c144_270 = arith.constant 144 : index
    %321 = vector.load %arg12[%c1_268, %c0_269, %c144_270] : memref<2x8x512xf32, #tpu.memory_space<vmem>>, vector<1x8x256xf32>
    %322 = vector.shape_cast %321 : vector<1x8x256xf32> to vector<8x256xf32>
    %c7_271 = arith.constant 7 : index
    %c0_272 = arith.constant 0 : index
    %c0_273 = arith.constant 0 : index
    %323 = vector.load %arg4[%c7_271, %c0_272, %c0_273] : memref<9x8x8xf32, #tpu.memory_space<vmem>>, vector<1x8x8xf32>
    %324 = vector.shape_cast %323 : vector<1x8x8xf32> to vector<8x8xf32>
    %cst_274 = arith.constant dense<0.000000e+00> : vector<8x256xf32>
    %325 = tpu.matmul %324, %320, %cst_274 {dimension_numbers = #tpu.dot_dimension_numbers<[1], [0], [0], [1], [0, 0, 1, 1], [], []>} : vector<8x8xf32>, vector<8x256xf32>, vector<8x256xf32> -> vector<8x256xf32>
    %326 = arith.addf %318, %325 : vector<8x256xf32>
    %c7_275 = arith.constant 7 : index
    %c0_276 = arith.constant 0 : index
    %c0_277 = arith.constant 0 : index
    %327 = vector.load %arg5[%c7_275, %c0_276, %c0_277] : memref<9x8x8xf32, #tpu.memory_space<vmem>>, vector<1x8x8xf32>
    %328 = vector.shape_cast %327 : vector<1x8x8xf32> to vector<8x8xf32>
    %cst_278 = arith.constant dense<0.000000e+00> : vector<8x256xf32>
    %329 = tpu.matmul %328, %322, %cst_278 {dimension_numbers = #tpu.dot_dimension_numbers<[1], [0], [0], [1], [0, 0, 1, 1], [], []>} : vector<8x8xf32>, vector<8x256xf32>, vector<8x256xf32> -> vector<8x256xf32>
    %330 = arith.addf %326, %329 : vector<8x256xf32>
    %c0_279 = arith.constant 0 : index
    %c0_280 = arith.constant 0 : index
    %c145_281 = arith.constant 145 : index
    %331 = vector.load %arg12[%c0_279, %c0_280, %c145_281] : memref<2x8x512xf32, #tpu.memory_space<vmem>>, vector<1x8x256xf32>
    %332 = vector.shape_cast %331 : vector<1x8x256xf32> to vector<8x256xf32>
    %c1_282 = arith.constant 1 : index
    %c0_283 = arith.constant 0 : index
    %c145_284 = arith.constant 145 : index
    %333 = vector.load %arg12[%c1_282, %c0_283, %c145_284] : memref<2x8x512xf32, #tpu.memory_space<vmem>>, vector<1x8x256xf32>
    %334 = vector.shape_cast %333 : vector<1x8x256xf32> to vector<8x256xf32>
    %335 = vector.broadcast %24 : vector<1x256xf32> to vector<8x256xf32>
    %336 = arith.mulf %332, %335 : vector<8x256xf32>
    %337 = vector.broadcast %24 : vector<1x256xf32> to vector<8x256xf32>
    %338 = arith.mulf %334, %337 : vector<8x256xf32>
    %c8_285 = arith.constant 8 : index
    %c0_286 = arith.constant 0 : index
    %c0_287 = arith.constant 0 : index
    %339 = vector.load %arg4[%c8_285, %c0_286, %c0_287] : memref<9x8x8xf32, #tpu.memory_space<vmem>>, vector<1x8x8xf32>
    %340 = vector.shape_cast %339 : vector<1x8x8xf32> to vector<8x8xf32>
    %cst_288 = arith.constant dense<0.000000e+00> : vector<8x256xf32>
    %341 = tpu.matmul %340, %336, %cst_288 {dimension_numbers = #tpu.dot_dimension_numbers<[1], [0], [0], [1], [0, 0, 1, 1], [], []>} : vector<8x8xf32>, vector<8x256xf32>, vector<8x256xf32> -> vector<8x256xf32>
    %342 = arith.addf %330, %341 : vector<8x256xf32>
    %c8_289 = arith.constant 8 : index
    %c0_290 = arith.constant 0 : index
    %c0_291 = arith.constant 0 : index
    %343 = vector.load %arg5[%c8_289, %c0_290, %c0_291] : memref<9x8x8xf32, #tpu.memory_space<vmem>>, vector<1x8x8xf32>
    %344 = vector.shape_cast %343 : vector<1x8x8xf32> to vector<8x8xf32>
    %cst_292 = arith.constant dense<0.000000e+00> : vector<8x256xf32>
    %345 = tpu.matmul %344, %338, %cst_292 {dimension_numbers = #tpu.dot_dimension_numbers<[1], [0], [0], [1], [0, 0, 1, 1], [], []>} : vector<8x8xf32>, vector<8x256xf32>, vector<8x256xf32> -> vector<8x256xf32>
    %346 = arith.addf %342, %345 : vector<8x256xf32>
    %c0_293 = arith.constant 0 : index
    %c0_294 = arith.constant 0 : index
    %347 = vector.load %arg6[%c0_293, %c0_294] : memref<8x1xf32, #tpu.memory_space<vmem>>, vector<8x1xf32>
    %348 = vector.broadcast %347 : vector<8x1xf32> to vector<8x256xf32>
    %349 = arith.addf %346, %348 : vector<8x256xf32>
    %cst_295 = arith.constant 0.000000e+00 : f32
    %350 = vector.broadcast %cst_295 : f32 to vector<8x256xf32>
    %351 = arith.maximumf %349, %350 : vector<8x256xf32>
    %c1_296 = arith.constant 1 : index
    %c0_297 = arith.constant 0 : index
    %c0_298 = arith.constant 0 : index
    %352 = vector.load %arg3[%c1_296, %c0_297, %c0_298] : memref<2x1x256xf32, #tpu.memory_space<vmem>>, vector<1x1x256xf32>
    %353 = vector.shape_cast %352 : vector<1x1x256xf32> to vector<1x256xf32>
    %354 = vector.broadcast %353 : vector<1x256xf32> to vector<8x256xf32>
    %355 = arith.mulf %351, %354 : vector<8x256xf32>
    %c0_299 = arith.constant 0 : index
    %c0_300 = arith.constant 0 : index
    %356 = vector.load %arg7[%c0_299, %c0_300] : memref<2x8xf32, #tpu.memory_space<vmem>>, vector<2x8xf32>
    %cst_301 = arith.constant dense<0.000000e+00> : vector<2x256xf32>
    %357 = tpu.matmul %356, %355, %cst_301 {dimension_numbers = #tpu.dot_dimension_numbers<[1], [0], [0], [1], [0, 0, 1, 1], [], []>} : vector<2x8xf32>, vector<8x256xf32>, vector<2x256xf32> -> vector<2x256xf32>
    %c0_302 = arith.constant 0 : index
    %c0_303 = arith.constant 0 : index
    %358 = vector.load %arg8[%c0_302, %c0_303] : memref<2x1xf32, #tpu.memory_space<vmem>>, vector<2x1xf32>
    %359 = vector.broadcast %358 : vector<2x1xf32> to vector<2x256xf32>
    %360 = arith.addf %357, %359 : vector<2x256xf32>
    %cst_304 = arith.constant 0.000000e+00 : f32
    %361 = vector.broadcast %cst_304 : f32 to vector<2x256xf32>
    %362 = arith.maximumf %360, %361 : vector<2x256xf32>
    %c0_305 = arith.constant 0 : index
    %c0_306 = arith.constant 0 : index
    %363 = vector.load %arg9[%c0_305, %c0_306] : memref<8x2xf32, #tpu.memory_space<vmem>>, vector<8x2xf32>
    %cst_307 = arith.constant dense<0.000000e+00> : vector<8x256xf32>
    %364 = tpu.matmul %363, %362, %cst_307 {dimension_numbers = #tpu.dot_dimension_numbers<[1], [0], [0], [1], [0, 0, 1, 1], [], []>} : vector<8x2xf32>, vector<2x256xf32>, vector<8x256xf32> -> vector<8x256xf32>
    %c0_308 = arith.constant 0 : index
    %c0_309 = arith.constant 0 : index
    %365 = vector.load %arg10[%c0_308, %c0_309] : memref<8x1xf32, #tpu.memory_space<vmem>>, vector<8x1xf32>
    %366 = vector.broadcast %365 : vector<8x1xf32> to vector<8x256xf32>
    %367 = arith.addf %364, %366 : vector<8x256xf32>
    %368 = arith.negf %367 : vector<8x256xf32>
    %369 = math.exp %368 : vector<8x256xf32>
    %cst_310 = arith.constant 1.000000e+00 : f32
    %370 = vector.broadcast %cst_310 : f32 to vector<8x256xf32>
    %371 = arith.addf %370, %369 : vector<8x256xf32>
    %372 = arith.divf %370, %371 : vector<8x256xf32>
    %373 = arith.mulf %372, %355 : vector<8x256xf32>
    %c1_311 = arith.constant 1 : index
    %c0_312 = arith.constant 0 : index
    %c0_313 = arith.constant 0 : index
    %374 = vector.load %arg1[%c1_311, %c0_312, %c0_313] : memref<2x8x256xf32, #tpu.memory_space<vmem>>, vector<1x8x256xf32>
    %375 = vector.shape_cast %374 : vector<1x8x256xf32> to vector<8x256xf32>
    %376 = arith.addf %373, %375 : vector<8x256xf32>
    %c1_314 = arith.constant 1 : index
    %c0_315 = arith.constant 0 : index
    %c0_316 = arith.constant 0 : index
    %377 = vector.load %arg11[%c1_314, %c0_315, %c0_316] : memref<2x8x256xf32, #tpu.memory_space<vmem>>, vector<1x8x256xf32>
    %378 = vector.shape_cast %377 : vector<1x8x256xf32> to vector<8x256xf32>
    %379 = vector.shape_cast %376 : vector<8x256xf32> to vector<1x8x256xf32>
    tpu.vector_store %arg11[%c1_314, %c0_315, %c0_316], %379 {strides = array<i32>} : memref<2x8x256xf32, #tpu.memory_space<vmem>>, vector<1x8x256xf32>,
    return
  }
  func.func @transform_0(%arg0: i32) -> (i32, i32, i32) {
    %c0_i32 = arith.constant 0 : i32
    %c0_i32_0 = arith.constant 0 : i32
    %c0_i32_1 = arith.constant 0 : i32
    return %arg0, %c0_i32, %c0_i32_0 : i32, i32, i32
  }
  func.func @transform_1(%arg0: i32) -> (i32, i32, i32) {
    %c0_i32 = arith.constant 0 : i32
    %c0_i32_0 = arith.constant 0 : i32
    %c0_i32_1 = arith.constant 0 : i32
    return %arg0, %c0_i32, %c0_i32_0 : i32, i32, i32
  }
  func.func @transform_2(%arg0: i32) -> (i32, i32, i32) {
    %c0_i32 = arith.constant 0 : i32
    %c0_i32_0 = arith.constant 0 : i32
    %c0_i32_1 = arith.constant 0 : i32
    return %arg0, %c0_i32, %c0_i32_0 : i32, i32, i32
  }
  func.func @transform_3(%arg0: i32) -> (i32, i32, i32) {
    %c0_i32 = arith.constant 0 : i32
    %c0_i32_0 = arith.constant 0 : i32
    %c0_i32_1 = arith.constant 0 : i32
    %c0_i32_2 = arith.constant 0 : i32
    return %c0_i32, %c0_i32_0, %c0_i32_1 : i32, i32, i32
  }
  func.func @transform_4(%arg0: i32) -> (i32, i32, i32) {
    %c0_i32 = arith.constant 0 : i32
    %c0_i32_0 = arith.constant 0 : i32
    %c0_i32_1 = arith.constant 0 : i32
    %c0_i32_2 = arith.constant 0 : i32
    return %c0_i32, %c0_i32_0, %c0_i32_1 : i32, i32, i32
  }
  func.func @transform_5(%arg0: i32) -> (i32, i32) {
    %c0_i32 = arith.constant 0 : i32
    %c0_i32_0 = arith.constant 0 : i32
    %c0_i32_1 = arith.constant 0 : i32
    return %c0_i32, %c0_i32_0 : i32, i32
  }
  func.func @transform_6(%arg0: i32) -> (i32, i32) {
    %c0_i32 = arith.constant 0 : i32
    %c0_i32_0 = arith.constant 0 : i32
    %c0_i32_1 = arith.constant 0 : i32
    return %c0_i32, %c0_i32_0 : i32, i32
  }
  func.func @transform_7(%arg0: i32) -> (i32, i32) {
    %c0_i32 = arith.constant 0 : i32
    %c0_i32_0 = arith.constant 0 : i32
    %c0_i32_1 = arith.constant 0 : i32
    return %c0_i32, %c0_i32_0 : i32, i32
  }
  func.func @transform_8(%arg0: i32) -> (i32, i32) {
    %c0_i32 = arith.constant 0 : i32
    %c0_i32_0 = arith.constant 0 : i32
    %c0_i32_1 = arith.constant 0 : i32
    return %c0_i32, %c0_i32_0 : i32, i32
  }
  func.func @transform_9(%arg0: i32) -> (i32, i32) {
    %c0_i32 = arith.constant 0 : i32
    %c0_i32_0 = arith.constant 0 : i32
    %c0_i32_1 = arith.constant 0 : i32
    return %c0_i32, %c0_i32_0 : i32, i32
  }
  func.func @transform_10(%arg0: i32) -> (i32, i32, i32) {
    %c0_i32 = arith.constant 0 : i32
    %c0_i32_0 = arith.constant 0 : i32
    %c0_i32_1 = arith.constant 0 : i32
    return %arg0, %c0_i32, %c0_i32_0 : i32, i32, i32
  }
}

</mosaic_0001>

<bundles_post_ra>
// kernel: tpu_custom_call.1
= control target key start
LH: loop header
LB: loop body
LE: loop exit
PB: predicated region body
PF: predicated region fallthrough
CT: control target
= control target key end

     0   :  { %v36_v0 = vlaneseq  ;;  %s4015_s0 = inlined_call_operand.vmem [shape: f32[2,8,256], index: 0, kind: input, shape index: {}]   ;;  %s4016_s1 = inlined_call_operand.vmem [shape: f32[2,8,256], index: 1, kind: input, shape index: {}]   ;;  %s4017_s2 = inlined_call_operand.vmem [shape: f32[2,1,256], index: 2, kind: input, shape index: {}]   ;;  %s4018_s3 = inlined_call_operand.vmem [shape: f32[9,8,8], index: 3, kind: input, shape index: {}]   ;;  %s4019_s4 = inlined_call_operand.vmem [shape: f32[9,8,8], index: 4, kind: input, shape index: {}]   ;;  %s4020_s5 = inlined_call_operand.vmem [shape: f32[8,1], index: 5, kind: input, shape index: {}]   ;;  %s4021_s6 = inlined_call_operand.vmem [shape: f32[2,8], index: 6, kind: input, shape index: {}]   ;;  %s4022_s7 = inlined_call_operand.vmem [shape: f32[2,1], index: 7, kind: input, shape index: {}]   ;;  %s4023_s8 = inlined_call_operand.vmem [shape: f32[8,2], index: 8, kind: input, shape index: {}]   ;;  %s4024_s9 = inlined_call_operand.vmem [shape: f32[8,1], index: 9, kind: input, shape index: {}]   ;;  %s4025_s10 = inlined_call_operand.hbm [shape: f32[2,8,256], index: 10, kind: output, shape index: {}]  }
   0x1   :  { %15 = vsyncpa [#allocation4], 0  ;;  %v3163_v5 = vmov 0.0   ;;  %s3164_s13 = smov 111   ;;  %s3165_s14 = smov 127   ;;  %v3246_v12 = vld [vmem:[%s4015_s0 + $0x8] sm:$0xff] }
   0x2   :  { %v37_v1 = vand.u32 127, %v36_v0  ;;  %s3166_s15 = smov 113   ;;  %s3167_s16 = smov 1   ;;  %v3251_v13 = vld [vmem:[%s4015_s0] sm:$0xff]  ;;  %vm100_vm4 = vcmask 908288   ;;  %v3259_v16 = vld [vmem:[%s4016_s1 + $0x8] sm:$0xff] }
   0x3   :  { %s3168_s17 = smov 15   ;;  %v2894_v14 = vpack.i.bf16 %v3246_v12, %v3251_v13  ;;  %s3169_s22 = smov 16   ;;  %v3264_v19 = vld [vmem:[%s4016_s1] sm:$0xff]  ;;  %v3269_v20 = vld [vmem:[%s4015_s0 + $0x10] sm:$0xff]  ;;  %v3274_v21 = vld [vmem:[%s4015_s0 + $0x18] sm:$0xff]  ;;  %vm354_vm5 = vcmask 924672  }
   0x4   :  { %v38_v2 = vadd.s32 128, %v37_v1  ;;  %v43_v3 = vand.u32 15, %v37_v1  ;;  %v3279_v22 = vld [vmem:[%s4016_s1 + $0x10] sm:$0xff]  ;;  %v3284_v23 = vld [vmem:[%s4016_s1 + $0x18] sm:$0xff]  ;;  %s3170_s20 = smov 17   ;;  %v2889_v43 = vpack.i.bf16 0.0, %v3259_v16  ;;  %v2879_v63 = vpack.i.bf16 %v3264_v19, %v3163_v5 }
   0x5   :  { %vm490_vm6 = vcmask 1039360   ;;  %vm512_vm7 = vcmask 7168   ;;  %vm376_vm8 = vcmask 121856   ;;  %s3171_s21 = smov 112   ;;  %vm122_vm9 = vcmask 138240   ;;  %s3173_s18 = smov [#allocation3]  }
   0x6   :  { %v50_v4 = vand.u32 15, %v38_v2  ;;  %vm63_vm0 = vcmp.ge.s32.totalorder %v43_v3, 1  ;;  %vm69_vm2 = vcmp.le.s32.totalorder %v43_v3, 14  ;;  %vm127_vm10 = vcmask 64512   ;;  %s2687_s19 = sshll.u32 %s3173_s18, 4  ;;  %s2688_s19 = int_to_ptr.vmem [resolvable:$true] %s2687_s19 }
   0x7   :  { %v2701_v6 = vsel %vm63_vm0, 1.0, %v3163_v5  ;;  %v2703_v9 = vsel %vm69_vm2, 1.0, %v3163_v5  ;;  %vm238_vm11 = vcmask 130048   ;;  %vm1001_vm12 = vcmask 916480  }
   0x8   :  { %vm64_vm1 = vcmp.ge.s32.totalorder %v50_v4, 1  ;;  %vm70_vm3 = vcmp.le.s32.totalorder %v50_v4, 14  ;;  %vm1326_vm13 = vcmask 1041408   ;;  %vm1322_vm14 = vcmask 15360  }
   0x9   :  { %v2702_v7 = vsel %vm64_vm1, 1.0, %v3163_v5  ;;  %v2704_v10 = vsel %vm70_vm3, 1.0, %v3163_v5 }
   0xa   :  { %v2844_v8 = vpack.i.bf16 %v2702_v7, %v2701_v6  ;;  %v3236_v11 = vpack.i.bf16 %v2704_v10, %v2703_v9 }
   0xc   :  { %2845 = vrot.lane.b32.xlu0 %v2844_v8, %s3164_s13  ;;  %2855 = vrot.lane.b32.xlu1 %v2844_v8, %s3165_s14 }
  0x14   :  { %2850 = vrot.lane.b32.xlu0 %v3236_v11, %s3166_s15  ;;  %2860 = vrot.lane.b32.xlu1 %v3236_v11, %s3167_s16 }
  0x1c   :  { %2865 = vrot.lane.b32.xlu1 %v2844_v8, %s3168_s17 }
  0x24   :  { %2895 = vrot.lane.b32.xlu1 %v2894_v14, %s3169_s22 }
  0x7e   :  { %v2846_v15 = vpop.permute.xlu0 %2845  ;;  %v2856_v37 = vpop.permute.xlu1 %2855 }
  0x7f   :  { %v2848_v17 = vunpack.i.h.bf16 %v2846_v15  ;;  %v2847_v18 = vunpack.i.l.bf16 %v2846_v15  ;;  %v3319_v48 = vunpack.i.h.bf16 %v2856_v37  ;;  %v2857_v49 = vunpack.i.l.bf16 %v2856_v37 }
  0x81   :  { %v101_v24 = vsel %vm100_vm4, %v2847_v18, %v2848_v17  ;;  %v3287_v25 = vmul.f32 0.0, %v2847_v18  ;;  %v107_v26 = vmul.f32 %v2848_v17, %v3246_v12  ;;  %v110_v27 = vmul.f32 %v2848_v17, %v3259_v16 }
  0x82   :  { %v109_v28 = vmul.f32 %v101_v24, %v3264_v19  ;;  %v3293_v29 = vmul.f32 %v3269_v20, %v101_v24  ;;  %v3296_v30 = vmul.f32 %v2848_v17, %v3274_v21  ;;  %v3300_v32 = vmul.f32 %v3279_v22, %v101_v24 }
  0x83   :  { %v2869_v31 = vpack.i.bf16 %v3287_v25, %v107_v26  ;;  %v3303_v33 = vmul.f32 %v2848_v17, %v3284_v23  ;;  %v106_v39 = vmul.f32 %v101_v24, %v3251_v13  ;;  %v3343_v60 = vmul.f32 0.0, %v2857_v49 }
  0x84   :  { %v2884_v34 = vpack.i.bf16 %v110_v27, %v109_v28  ;;  %v3011_v35 = vpack.i.bf16 %v3293_v29, %v3287_v25  ;;  %v2996_v36 = vpack.i.bf16 %v3287_v25, %v3296_v30  ;;  %v500_v61 = vmul.f32 %v3319_v48, %v3259_v16 }
  0x85   :  { %2870 = vrot.lane.b32.xlu2 %v2869_v31, %s3170_s20  ;;  %v3016_v38 = vpack.i.bf16 %v3303_v33, %v3300_v32  ;;  %v2874_v46 = vpack.i.bf16 %v106_v39, %v3287_v25  ;;  %v491_v4 = vsel %vm490_vm6, %v2857_v49, %v3319_v48  ;;  %v3001_v29 = vpack.i.bf16 %v3279_v22, %v3163_v5  ;;  %v3588_v25 = vld [vmem:[%s4018_s3 + $0x18] sm:$0xff] }
  0x86   :  { %2885 = vrot.lane.b32.xlu0 %v2884_v34, %s3170_s20  ;;  %v2851_v40 = vpop.permute.xlu0 %2850  ;;  %v2861_v56 = vpop.permute.xlu1 %2860  ;;  %v2924_v1 = vpack.i.bf16 %v3343_v60, %v500_v61  ;;  %v499_v7 = vmul.f32 %v491_v4, %v3264_v19  ;;  %v3396_v49 = vmul.f32 %v3269_v20, %v491_v4  ;;  %v3006_v33 = vpack.i.bf16 0.0, %v3284_v23 }
  0x87   :  { %v2853_v41 = vunpack.i.h.bf16 %v2851_v40  ;;  %v2852_v42 = vunpack.i.l.bf16 %v2851_v40  ;;  %v2863_v2 = vunpack.i.h.bf16 %v2861_v56  ;;  %v2862_v3 = vunpack.i.l.bf16 %v2861_v56 }
  0x88   :  { %v2919_v15 = vpack.i.bf16 %v499_v7, %v3343_v60 }
  0x89   :  { %v355_v44 = vsel %vm354_vm5, %v2852_v42, %v2853_v41  ;;  %v361_v45 = vmul.f32 %v2853_v41, %v3246_v12  ;;  %v3321_v50 = vmul.f32 0.0, %v2852_v42  ;;  %v3327_v52 = vmul.f32 %v2853_v41, %v3284_v23 }
  0x8a   :  { %v360_v47 = vmul.f32 %v355_v44, %v3251_v13  ;;  %v3324_v51 = vmul.f32 %v3279_v22, %v355_v44  ;;  %v3330_v53 = vmul.f32 %v3269_v20, %v355_v44  ;;  %v3333_v55 = vmul.f32 %v2853_v41, %v3274_v21 }
  0x8b   :  { %v3026_v58 = vpack.i.bf16 %v3321_v50, %v3327_v52  ;;  %v364_v59 = vmul.f32 %v2853_v41, %v3259_v16  ;;  %v363_v6 = vmul.f32 %v355_v44, %v3264_v19  ;;  %v3360_v8 = vmul.f32 0.0, %v2863_v2 }
  0x8c   :  { %v2914_v54 = vpack.i.bf16 %v361_v45, %v360_v47  ;;  %v3031_v57 = vpack.i.bf16 %v3324_v51, %v3321_v50  ;;  %v3036_v62 = vpack.i.bf16 %v3333_v55, %v3330_v53  ;;  %v730_v9 = vmul.f32 %v2862_v3, %v3251_v13  ;;  %v3657_v53 = vld [vmem:[%s4018_s3 + $0x28] sm:$0xff] }
  0x8d   :  { %2875 = vrot.lane.b32.xlu2 %v2874_v46, %s3170_s20  ;;  %v2899_v0 = vpack.i.bf16 %v3321_v50, %v364_v59  ;;  %v2904_v14 = vpack.i.bf16 %v363_v6, %v3321_v50  ;;  %v726_v26 = vsel %vm512_vm7, %v2862_v3, %v2863_v2  ;;  %v733_v28 = vmul.f32 %v2862_v3, %v3264_v19  ;;  %v3648_v50 = vld [vmem:[%s4019_s4 + $0x28] sm:$0xff] }
  0x8e   :  { %2890 = vrot.lane.b32.xlu0 %v2889_v43, %s3169_s22  ;;  %2915 = vrot.lane.b32.xlu1 %v2914_v54, %s3168_s17  ;;  %v2866_v10 = vpop.permute.xlu1 %2865  ;;  %v2934_v24 = vpack.i.bf16 %v730_v9, %v3360_v8  ;;  %v734_v31 = vmul.f32 %v726_v26, %v3259_v16  ;;  %v496_v41 = vmul.f32 %v491_v4, %v3251_v13 }
  0x8f   :  { %v2868_v17 = vunpack.i.h.bf16 %v2866_v10  ;;  %v2867_v18 = vunpack.i.l.bf16 %v2866_v10  ;;  %v497_v42 = vmul.f32 %v3319_v48, %v3246_v12  ;;  %v3393_v47 = vmul.f32 %v3319_v48, %v3284_v23 }
  0x90   :  { %v2944_v37 = vpack.i.bf16 %v734_v31, %v733_v28  ;;  %v3400_v54 = vmul.f32 %v3319_v48, %v3274_v21  ;;  %v731_v48 = vmul.f32 %v726_v26, %v3246_v12  ;;  %v3417_v2 = vmul.f32 %v2862_v3, %v3279_v22 }
  0x91   :  { %v3369_v27 = vmul.f32 0.0, %v2868_v17  ;;  %v864_v34 = vmul.f32 %v2867_v18, %v3251_v13  ;;  %v860_v40 = vsel %vm376_vm8, %v2867_v18, %v2868_v17  ;;  %v867_v43 = vmul.f32 %v2867_v18, %v3264_v19 }
  0x92   :  { %v868_v44 = vmul.f32 %v860_v40, %v3259_v16  ;;  %v2929_v45 = vpack.i.bf16 %v497_v42, %v496_v41  ;;  %v3046_v59 = vpack.i.bf16 %v3343_v60, %v3393_v47  ;;  %v3423_v6 = vmul.f32 %v2862_v3, %v3269_v20 }
  0x93   :  { %v2939_v39 = vpack.i.bf16 %v864_v34, %v3369_v27  ;;  %v3426_v7 = vmul.f32 %v3274_v21, %v726_v26  ;;  %v3438_v3 = vmul.f32 %v2867_v18, %v3279_v22  ;;  %v3447_v28 = vmul.f32 %v3274_v21, %v860_v40 }
  0x94   :  { %v2954_v46 = vpack.i.bf16 %v868_v44, %v867_v43  ;;  %v111_v44 = vld [vmem:[%s4018_s3] sm:$0xff] }
  0x95   :  { %2880 = vrot.lane.b32.xlu2 %v2879_v63, %s3169_s22  ;;  %v2964_v63 = vpack.i.bf16 %v3251_v13, %v3163_v5 }
  0x96   :  { %2900 = vrot.lane.b32.xlu0 %v2899_v0, %s3168_s17  ;;  %2925 = vrot.lane.b32.xlu1 %v2924_v1, %s3167_s16  ;;  %v2959_v0 = vpack.i.bf16 %v3259_v16, %v3264_v19  ;;  %v2949_v1 = vpack.i.bf16 %v3360_v8, %v731_v48 }
  0x9d   :  { %2905 = vrot.lane.b32.xlu2 %v2904_v14, %s3168_s17 }
  0x9e   :  { %2920 = vrot.lane.b32.xlu0 %v2919_v15, %s3167_s16  ;;  %2935 = vrot.lane.b32.xlu1 %v2934_v24, %s3165_s14  ;;  %v865_v15 = vmul.f32 %v860_v40, %v3246_v12  ;;  %v3441_v24 = vmul.f32 %v3284_v23, %v860_v40 }
  0xa0   :  { %v2969_v17 = vpack.i.bf16 %v3369_v27, %v865_v15 }
  0xa5   :  { %2910 = vrot.lane.b32.xlu2 %v3236_v11, %s3170_s20  ;;  %v3389_v11 = vmul.f32 %v3279_v22, %v491_v4  ;;  %v3420_v4 = vmul.f32 %v3284_v23, %v726_v26  ;;  %v3444_v26 = vmul.f32 %v2867_v18, %v3269_v20 }
  0xa6   :  { %2945 = vrot.lane.b32.xlu0 %v2944_v37, %s3165_s14  ;;  %2940 = vrot.lane.b32.xlu1 %v2939_v39, %s3166_s15  ;;  %v2974_v39 = vpack.i.bf16 0.0, %v3246_v12 }
  0xa7   :  { %v3041_v56 = vpack.i.bf16 %v3389_v11, %v3343_v60  ;;  %v3682_v60 = vld [vmem:[%s4019_s4 + $0x30] sm:$0xff] }
  0xad   :  { %2930 = vrot.lane.b32.xlu2 %v2929_v45, %s3167_s16 }
  0xae   :  { %2955 = vrot.lane.b32.xlu0 %v2954_v46, %s3166_s15  ;;  %2965 = vrot.lane.b32.xlu1 %v2964_v63, %s3171_s21  ;;  %v3172_v63 = vmov 0  }
  0xaf   :  { %2995 = vset.pattern.permute.xlu1 %v3172_v63  ;;  %2994 = vset.pattern.permute.xlu0 %v3172_v63 }
  0xb0   :  { %3116 = vset.pattern.permute.xlu2 %v3172_v63 }
  0xb5   :  { %2950 = vrot.lane.b32.xlu2 %v2949_v1, %s3165_s14 }
  0xb6   :  { %2960 = vrot.lane.b32.xlu0 %v2959_v0, %s3171_s21 }
  0xbd   :  { %2970 = vrot.lane.b32.xlu2 %v2969_v17, %s3166_s15  ;;  %v2896_v17 = vpop.permute.xlu1 %2895 }
  0xc5   :  { %2975 = vrot.lane.b32.xlu2 %v2974_v39, %s3171_s21  ;;  %v2898_v39 = vunpack.i.h.bf16 %v2896_v17 }
  0xdf   :  { %v2871_v18 = vpop.permute.xlu2 %2870 }
  0xe0   :  { %v2872_v40 = vunpack.i.l.bf16 %v2871_v18 }
  0xe7   :  { %v2876_v41 = vpop.permute.xlu2 %2875 }
  0xe8   :  { %v2878_v42 = vunpack.i.h.bf16 %v2876_v41  ;;  %v2877_v43 = vunpack.i.l.bf16 %v2876_v41  ;;  %v2897_v41 = vunpack.i.l.bf16 %v2896_v17 }
  0xea   :  { %v180_v45 = vsel %vm122_vm9, %v2877_v43, %v2878_v42  ;;  %v181_v46 = vsel %vm122_vm9, %v2878_v42, %v2872_v40 }
  0xeb   :  { %202 = vmatpush.msra.mxu2 %v180_v45  ;;  %222 = vmatpush.msra.mxu3 %v181_v46  ;;  %v2873_v45 = vunpack.i.h.bf16 %v2871_v18 }
  0xec   :  { %2707 = vmatmul.msk.f32.vlgmr.msra.gmra.mxu2 %vm127_vm10, %v111_v44  ;;  %2708 = vmatmul.msk.f32.vlgmr.msra.gmra.mxu3 %vm127_vm10, %v111_v44 }
  0xef   :  { %v2881_v0 = vpop.permute.xlu2 %2880 }
  0xf0   :  { %v2883_v48 = vunpack.i.h.bf16 %v2881_v0  ;;  %v2882_v1 = vunpack.i.l.bf16 %v2881_v0  ;;  %v240_v0 = vsel %vm238_vm11, %v2897_v41, %v2898_v39 }
  0xf2   :  { %v299_v15 = vsel %vm238_vm11, %v2882_v1, %v2883_v48  ;;  %v3475_v1 = vld [vmem:[%s4019_s4] sm:$0xff] }
  0xf3   :  { %321 = vmatpush.msrb.mxu2 %v299_v15 }
  0xf7   :  { %v3466_v40 = vpop.permute.xlu2 %2905 }
  0xf8   :  { %v2908_v42 = vunpack.i.h.bf16 %v3466_v40  ;;  %v2907_v43 = vunpack.i.l.bf16 %v3466_v40  ;;  %v2886_v44 = vpop.permute.xlu0 %2885 }
  0xf9   :  { %v2888_v46 = vunpack.i.h.bf16 %v2886_v44  ;;  %v2887_v63 = vunpack.i.l.bf16 %v2886_v44 }
  0xfa   :  { %v437_v37 = vsel %vm376_vm8, %v2907_v43, %v2908_v42 }
  0xfb   :  { %459 = vmatpush.msra.mxu2 %v437_v37  ;;  %v123_v15 = vsel %vm122_vm9, %v2873_v45, %v2887_v63  ;;  %v124_v17 = vsel %vm122_vm9, %v2887_v63, %v2888_v46 }
  0xfc   :  { %146 = vmatpush.msra.mxu0 %v123_v15  ;;  %166 = vmatpush.msra.mxu1 %v124_v17 }
  0xfd   :  { %2705 = vmatmul.msk.f32.vlgmr.msra.gmra.mxu0 %vm127_vm10, %v3475_v1  ;;  %2706 = vmatmul.msk.f32.vlgmr.msra.gmra.mxu1 %vm127_vm10, %v3475_v1 }
  0xfe   :  { %281 = vmatpush.msrb.mxu1 %v240_v0 }
  0xff   :  { %v2911_v18 = vpop.permute.xlu2 %2910 }
 0x100   :  { %v2913_v39 = vunpack.i.h.bf16 %v2911_v18  ;;  %v2912_v40 = vunpack.i.l.bf16 %v2911_v18  ;;  %v2891_v43 = vpop.permute.xlu0 %2890  ;;  %v2916_v44 = vpop.permute.xlu1 %2915 }
 0x101   :  { %v2893_v34 = vunpack.i.h.bf16 %v2891_v43  ;;  %v2892_v37 = vunpack.i.l.bf16 %v2891_v43  ;;  %v2918_v14 = vunpack.i.h.bf16 %v2916_v44  ;;  %v2917_v45 = vunpack.i.l.bf16 %v2916_v44 }
 0x102   :  { %v3483_v31 = vmul.f32 0.0, %v2913_v39  ;;  %v1115_v46 = vsel %vm122_vm9, %v2912_v40, %v2913_v39  ;;  %v1119_v63 = vmul.f32 %v2912_v40, %v3251_v13  ;;  %v1122_v0 = vmul.f32 %v2912_v40, %v3264_v19 }
 0x103   :  { %v300_v15 = vsel %vm238_vm11, %v2883_v48, %v2892_v37  ;;  %v1123_v17 = vmul.f32 %v1115_v46, %v3259_v16  ;;  %v1120_v18 = vmul.f32 %v1115_v46, %v3246_v12  ;;  %v239_v10 = vsel %vm238_vm11, %v2893_v34, %v2897_v41 }
 0x104   :  { %341 = vmatpush.msrb.mxu3 %v300_v15  ;;  %v2984_v43 = vpack.i.bf16 %v1119_v63, %v3483_v31  ;;  %261 = vmatpush.msrb.mxu0 %v239_v10  ;;  %v378_v44 = vsel %vm376_vm8, %v2917_v45, %v2918_v14  ;;  %v3495_v39 = vmul.f32 %v2912_v40, %v3279_v22  ;;  %v3513_v10 = vld [vmem:[%s4019_s4 + $0x8] sm:$0xff]  ;;  %v1264_v15 = vld [vmem:[%s4022_s7] sm:$0x3] }
 0x105   :  { %v2979_v61 = vpack.i.bf16 %v1123_v17, %v1122_v0  ;;  %v2989_v9 = vpack.i.bf16 %v3483_v31, %v1120_v18  ;;  %419 = vmatpush.msra.mxu1 %v378_v44  ;;  %v3499_v48 = vmul.f32 %v3284_v23, %v1115_v46  ;;  %v3502_v37 = vmul.f32 %v2912_v40, %v3269_v20  ;;  %v3518_v14 = vld [vmem:[%s4018_s3 + $0x8] sm:$0xff]  ;;  %v3542_v18 = vld [vmem:[%s4020_s5] sm:$0xff] }
 0x106   :  { %2985 = vrot.lane.b32.xlu1 %v2984_v43, %s3164_s13  ;;  %v3506_v34 = vmul.f32 %v3274_v21, %v1115_v46  ;;  %2713 = vmatmul.msk.f32.vlgmr.msrb.gmra.mxu2 %vm127_vm10, %v3513_v10 }
 0x107   :  { %2980 = vrot.lane.b32.xlu0 %v2979_v61, %s3164_s13  ;;  %2990 = vrot.lane.b32.xlu2 %v2989_v9, %s3164_s13  ;;  %v3101_v41 = vpack.i.bf16 %v3499_v48, %v3495_v39  ;;  %v3106_v40 = vpack.i.bf16 %v3502_v37, %v3483_v31 }
 0x108   :  { %v2901_v46 = vpop.permute.xlu0 %2900  ;;  %2714 = vmatmul.msk.f32.vlgmr.msrb.gmra.mxu3 %vm127_vm10, %v3513_v10  ;;  %2710 = vmatmul.msk.f32.vlgmr.msrb.gmra.mxu0 %vm127_vm10, %v3518_v14  ;;  %v2926_v43 = vpop.permute.xlu1 %2925 }
 0x109   :  { %v2903_v9 = vunpack.i.h.bf16 %v2901_v46  ;;  %v2902_v63 = vunpack.i.l.bf16 %v2901_v46  ;;  %2711 = vmatmul.msk.f32.vlgmr.msrb.gmra.mxu1 %vm127_vm10, %v3518_v14 }
 0x10b   :  { %v438_v0 = vsel %vm376_vm8, %v2908_v42, %v2902_v63  ;;  %v377_v17 = vsel %vm376_vm8, %v2903_v9, %v2917_v45  ;;  %v3552_v42 = vld [vmem:[%s4019_s4 + $0x10] sm:$0xff]  ;;  %v2928_v63 = vunpack.i.h.bf16 %v2926_v43 }
 0x10c   :  { %479 = vmatpush.msra.mxu3 %v438_v0  ;;  %399 = vmatpush.msra.mxu0 %v377_v17  ;;  %v3557_v45 = vld [vmem:[%s4018_s3 + $0x10] sm:$0xff]  ;;  %v2931_v0 = vpop.permute.xlu2 %2930 }
 0x10d   :  { %v2932_v17 = vunpack.i.l.bf16 %v2931_v0 }
 0x10e   :  { %1267 = vperm.xlu1 %2995, %v1264_v15   ;;  %2719 = vmatmul.msk.f32.vlgmr.msra.gmra.mxu2 %vm127_vm10, %v3552_v42  ;;  %v2933_v15 = vunpack.i.h.bf16 %v2931_v0 }
 0x10f   :  { %1248 = vperm.xlu0 %2994, %v3542_v18   ;;  %3012 = vrot.lane.b32.xlu2 %v3011_v35, %s3170_s20  ;;  %v2927_v35 = vunpack.i.l.bf16 %v2926_v43  ;;  %v3583_v43 = vld [vmem:[%s4019_s4 + $0x18] sm:$0xff]  ;;  %v513_v30 = vsel %vm512_vm7, %v2928_v63, %v2932_v17 }
 0x110   :  { %2720 = vmatmul.msk.f32.vlgmr.msra.gmra.mxu3 %vm127_vm10, %v3552_v42  ;;  %v2921_v44 = vpop.permute.xlu0 %2920  ;;  %2716 = vmatmul.msk.f32.vlgmr.msra.gmra.mxu0 %vm127_vm10, %v3557_v45  ;;  %v514_v32 = vsel %vm512_vm7, %v2932_v17, %v2933_v15  ;;  %v4026_v17 = vpack.i.bf16 %v3420_v4, %v3417_v2 }
 0x111   :  { %2717 = vmatmul.msk.f32.vlgmr.msra.gmra.mxu1 %vm127_vm10, %v3557_v45  ;;  %v2923_v46 = vunpack.i.h.bf16 %v2921_v44  ;;  %v2922_v9 = vunpack.i.l.bf16 %v2921_v44  ;;  %535 = vmatpush.msrb.mxu0 %v513_v30 }
 0x112   :  { %555 = vmatpush.msrb.mxu1 %v514_v32 }
 0x113   :  { %v573_v61 = vsel %vm512_vm7, %v2922_v9, %v2923_v46  ;;  %v574_v44 = vsel %vm512_vm7, %v2923_v46, %v2927_v35  ;;  %642 = vmatpush.msra.mxu0 %v3251_v13 }
 0x114   :  { %595 = vmatpush.msrb.mxu2 %v573_v61  ;;  %615 = vmatpush.msrb.mxu3 %v574_v44  ;;  %v4027_v44 = vpack.i.bf16 %v3400_v54, %v3396_v49  ;;  %v3691_v49 = vld [vmem:[%s4018_s3 + $0x30] sm:$0xff] }
 0x115   :  { %662 = vmatpush.msra.mxu1 %v3246_v12  ;;  %v3621_v12 = vld [vmem:[%s4018_s3 + $0x20] sm:$0xff] }
 0x116   :  { %2997 = vrot.lane.b32.xlu1 %v2996_v36, %s3170_s20  ;;  %2725 = vmatmul.msk.f32.vlgmr.msrb.gmra.mxu2 %vm127_vm10, %v3583_v43  ;;  %v3021_v36 = vpack.i.bf16 %v3274_v21, %v3269_v20 }
 0x117   :  { %3002 = vrot.lane.b32.xlu0 %v3001_v29, %s3169_s22  ;;  %3017 = vrot.lane.b32.xlu2 %v3016_v38, %s3170_s20  ;;  %v3616_v38 = vld [vmem:[%s4019_s4 + $0x20] sm:$0xff]  ;;  %v2951_v29 = vpop.permute.xlu2 %2950 }
 0x118   :  { %2726 = vmatmul.msk.f32.vlgmr.msrb.gmra.mxu3 %vm127_vm10, %v3583_v43  ;;  %2722 = vmatmul.msk.f32.vlgmr.msrb.gmra.mxu0 %vm127_vm10, %v3588_v25  ;;  %v2953_v52 = vunpack.i.h.bf16 %v2951_v29 }
 0x119   :  { %2723 = vmatmul.msk.f32.vlgmr.msrb.gmra.mxu1 %vm127_vm10, %v3588_v25  ;;  %689 = vmatpush.msra.mxu2 %v3264_v19  ;;  %v2936_v19 = vpop.permute.xlu1 %2935 }
 0x11a   :  { %709 = vmatpush.msra.mxu3 %v3259_v16  ;;  %v2946_v16 = vpop.permute.xlu0 %2945  ;;  %v2937_v13 = vunpack.i.l.bf16 %v2936_v19  ;;  %v2938_v61 = vunpack.i.h.bf16 %v2936_v19 }
 0x11b   :  { %v2948_v51 = vunpack.i.h.bf16 %v2946_v16 }
 0x11d   :  { %v808_v46 = vsel %vm490_vm6, %v2948_v51, %v2937_v13 }
 0x11e   :  { %3007 = vrot.lane.b32.xlu1 %v3006_v33, %s3169_s22  ;;  %2731 = vmatmul.msk.f32.vlgmr.msra.gmra.mxu2 %vm127_vm10, %v3616_v38 }
 0x11f   :  { %3032 = vrot.lane.b32.xlu0 %v3031_v57, %s3168_s17  ;;  %3022 = vrot.lane.b32.xlu2 %v3021_v36, %s3169_s22  ;;  %v2947_v57 = vunpack.i.l.bf16 %v2946_v16  ;;  %v2971_v30 = vpop.permute.xlu2 %2970 }
 0x120   :  { %2732 = vmatmul.msk.f32.vlgmr.msra.gmra.mxu3 %vm127_vm10, %v3616_v38  ;;  %2728 = vmatmul.msk.f32.vlgmr.msra.gmra.mxu0 %vm127_vm10, %v3621_v12  ;;  %v2973_v47 = vunpack.i.h.bf16 %v2971_v30 }
 0x121   :  { %2729 = vmatmul.msk.f32.vlgmr.msra.gmra.mxu1 %vm127_vm10, %v3621_v12  ;;  %v807_v35 = vsel %vm490_vm6, %v2947_v57, %v2948_v51  ;;  %849 = vmatpush.msrb.mxu3 %v808_v46  ;;  %v2941_v11 = vpop.permute.xlu1 %2940  ;;  %v4028_v51 = vpack.i.bf16 %v3423_v6, %v3360_v8  ;;  %v4029_v46 = vpack.i.bf16 %v3441_v24, %v3438_v3  ;;  %v3725_v3 = vld [vmem:[%s4018_s3 + $0x38] sm:$0xff] }
 0x122   :  { %829 = vmatpush.msrb.mxu2 %v807_v35  ;;  %v2942_v9 = vunpack.i.l.bf16 %v2941_v11  ;;  %v2943_v15 = vunpack.i.h.bf16 %v2941_v11  ;;  %v3708_v35 = vld [vmem:[%s4019_s4 + $0x38] sm:$0xff]  ;;  %v4030_v6 = vpack.i.bf16 %v3360_v8, %v3426_v7  ;;  %v3081_v7 = vpack.i.bf16 %v3284_v23, %v3279_v22 }
 0x123   :  { %v3086_v22 = vpack.i.bf16 %v3269_v20, %v3163_v5  ;;  %v3096_v23 = vpack.i.bf16 0.0, %v3274_v21  ;;  %v4033_v5 = vpack.i.bf16 %v3483_v31, %v3506_v34  ;;  %v2581_v31 = vld [vmem:[%s4024_s9] sm:$0xff] }
 0x126   :  { %3027 = vrot.lane.b32.xlu1 %v3026_v58, %s3168_s17  ;;  %v2952_v58 = vunpack.i.l.bf16 %v2951_v29  ;;  %2737 = vmatmul.msk.f32.vlgmr.msrb.gmra.mxu2 %vm127_vm10, %v3648_v50 }
 0x127   :  { %3042 = vrot.lane.b32.xlu0 %v3041_v56, %s3167_s16  ;;  %3037 = vrot.lane.b32.xlu2 %v3036_v62, %s3168_s17  ;;  %v2956_v56 = vpop.permute.xlu0 %2955  ;;  %s3174_s17 = smov 256  }
 0x128   :  { %2738 = vmatmul.msk.f32.vlgmr.msrb.gmra.mxu3 %vm127_vm10, %v3648_v50  ;;  %v747_v55 = vsel %vm490_vm6, %v2938_v61, %v2952_v58  ;;  %v748_v62 = vsel %vm490_vm6, %v2952_v58, %v2953_v52  ;;  %v2958_v63 = vunpack.i.h.bf16 %v2956_v56  ;;  %v2957_v0 = vunpack.i.l.bf16 %v2956_v56  ;;  %v2976_v52 = vpop.permute.xlu2 %2975 }
 0x129   :  { %769 = vmatpush.msrb.mxu0 %v747_v55  ;;  %789 = vmatpush.msrb.mxu1 %v748_v62  ;;  %v2966_v4 = vpop.permute.xlu1 %2965  ;;  %v2978_v58 = vunpack.i.h.bf16 %v2976_v52  ;;  %v2977_v11 = vunpack.i.l.bf16 %v2976_v52  ;;  %v4031_v56 = vpack.i.bf16 %v3444_v26, %v3369_v27  ;;  %v4032_v55 = vpack.i.bf16 %v3369_v27, %v3447_v28  ;;  %v3765_v26 = vld [vmem:[%s4018_s3 + $0x40] sm:$0xff] }
 0x12a   :  { %2734 = vmatmul.msk.f32.vlgmr.msrb.gmra.mxu0 %vm127_vm10, %v3657_v53  ;;  %2735 = vmatmul.msk.f32.vlgmr.msrb.gmra.mxu1 %vm127_vm10, %v3657_v53  ;;  %v941_v32 = vsel %vm354_vm5, %v2957_v0, %v2958_v63  ;;  %v942_v33 = vsel %vm354_vm5, %v2958_v63, %v2942_v9  ;;  %v2967_v19 = vunpack.i.l.bf16 %v2966_v4  ;;  %v2968_v57 = vunpack.i.h.bf16 %v2966_v4  ;;  %v3777_v62 = vld [vmem:[%s4019_s4 + $0x40] sm:$0xff] }
 0x12b   :  { %963 = vmatpush.msra.mxu2 %v941_v32  ;;  %983 = vmatpush.msra.mxu3 %v942_v33  ;;  %v1003_v8 = vsel %vm1001_vm12, %v2977_v11, %v2978_v58 }
 0x12c   :  { %v1002_v24 = vsel %vm1001_vm12, %v2968_v57, %v2977_v11 }
 0x12e   :  { %3047 = vrot.lane.b32.xlu1 %v3046_v59, %s3167_s16  ;;  %v2972_v59 = vunpack.i.l.bf16 %v2971_v30  ;;  %2743 = vmatmul.msk.f32.vlgmr.msra.gmra.mxu2 %vm127_vm10, %v3682_v60 }
 0x12f   :  { %3067 = vrot.lane.b32.xlu0 %v4026_v17, %s3165_s14  ;;  %3052 = vrot.lane.b32.xlu2 %v4027_v44, %s3167_s16  ;;  %v2961_v36 = vpop.permute.xlu0 %2960 }
 0x130   :  { %2744 = vmatmul.msk.f32.vlgmr.msra.gmra.mxu3 %vm127_vm10, %v3682_v60  ;;  %v881_v54 = vsel %vm354_vm5, %v2943_v15, %v2972_v59  ;;  %v882_v2 = vsel %vm354_vm5, %v2972_v59, %v2973_v47  ;;  %v2963_v16 = vunpack.i.h.bf16 %v2961_v36  ;;  %v2962_v13 = vunpack.i.l.bf16 %v2961_v36 }
 0x131   :  { %903 = vmatpush.msra.mxu0 %v881_v54  ;;  %923 = vmatpush.msra.mxu1 %v882_v2 }
 0x132   :  { %2740 = vmatmul.msk.f32.vlgmr.msra.gmra.mxu0 %vm127_vm10, %v3691_v49  ;;  %2741 = vmatmul.msk.f32.vlgmr.msra.gmra.mxu1 %vm127_vm10, %v3691_v49  ;;  %v1062_v61 = vsel %vm1001_vm12, %v2962_v13, %v2963_v16  ;;  %v1063_v29 = vsel %vm1001_vm12, %v2963_v16, %v2967_v19 }
 0x133   :  { %1084 = vmatpush.msrb.mxu2 %v1062_v61  ;;  %1104 = vmatpush.msrb.mxu3 %v1063_v29 }
 0x134   :  { %1024 = vmatpush.msrb.mxu0 %v1002_v24  ;;  %1044 = vmatpush.msrb.mxu1 %v1003_v8 }
 0x136   :  { %3057 = vrot.lane.b32.xlu1 %v4028_v51, %s3165_s14  ;;  %2749 = vmatmul.msk.f32.vlgmr.msrb.gmra.mxu2 %vm127_vm10, %v3708_v35 }
 0x137   :  { %3077 = vrot.lane.b32.xlu0 %v4029_v46, %s3166_s15  ;;  %3072 = vrot.lane.b32.xlu2 %v4030_v6, %s3165_s14 }
 0x138   :  { %2750 = vmatmul.msk.f32.vlgmr.msrb.gmra.mxu3 %vm127_vm10, %v3708_v35 }
 0x13a   :  { %2746 = vmatmul.msk.f32.vlgmr.msrb.gmra.mxu0 %vm127_vm10, %v3725_v3  ;;  %2747 = vmatmul.msk.f32.vlgmr.msrb.gmra.mxu1 %vm127_vm10, %v3725_v3 }
 0x13e   :  { %3062 = vrot.lane.b32.xlu1 %v4031_v56, %s3166_s15 }
 0x13f   :  { %3082 = vrot.lane.b32.xlu0 %v3081_v7, %s3171_s21  ;;  %3092 = vrot.lane.b32.xlu2 %v4032_v55, %s3166_s15 }
 0x146   :  { %3087 = vrot.lane.b32.xlu1 %v3086_v22, %s3171_s21 }
 0x147   :  { %3102 = vrot.lane.b32.xlu0 %v3101_v41, %s3164_s13  ;;  %3097 = vrot.lane.b32.xlu2 %v3096_v23, %s3171_s21 }
 0x14e   :  { %3107 = vrot.lane.b32.xlu1 %v3106_v40, %s3164_s13 }
 0x14f   :  { %3112 = vrot.lane.b32.xlu2 %v4033_v5, %s3164_s13  ;;  %2512 = vperm.xlu0 %2994, %v3542_v18  }
 0x157   :  { %2584 = vperm.xlu0 %2994, %v2581_v31   ;;  %1319 = vperm.xlu2 %3116, %v2581_v31  }
 0x161   :  { %v2991_v20 = vpop.permute.xlu2 %2990 }
 0x162   :  { %v2993_v21 = vunpack.i.h.bf16 %v2991_v20  ;;  %v2992_v27 = vunpack.i.l.bf16 %v2991_v20 }
 0x164   :  { %v1137_v28 = vsel %vm100_vm4, %v2992_v27, %v2993_v21 }
 0x165   :  { %1178 = vmatpush.msra.mxu1 %v1137_v28 }
 0x166   :  { %2753 = vmatmul.msk.f32.vlgmr.msra.gmra.mxu1 %vm127_vm10, %v3765_v26 }
 0x169   :  { %v3789_v15 = vpop.permute.xlu2 %3012 }
 0x16a   :  { %v3015_v44 = vunpack.i.h.bf16 %v3789_v15 }
 0x16f   :  { %v204_v59 = vpop.f32.mrf.mxu2  ;;  %v224_v54 = vpop.f32.mrf.mxu3 }
 0x178   :  { %v2986_v39 = vpop.permute.xlu1 %2985 }
 0x179   :  { %v2988_v48 = vunpack.i.h.bf16 %v2986_v39  ;;  %v2987_v37 = vunpack.i.l.bf16 %v2986_v39  ;;  %v2981_v34 = vpop.permute.xlu0 %2980 }
 0x17a   :  { %v2983_v41 = vunpack.i.h.bf16 %v2981_v34  ;;  %v2982_v40 = vunpack.i.l.bf16 %v2981_v34  ;;  %v148_v33 = vpop.f32.mrf.mxu0  ;;  %v168_v47 = vpop.f32.mrf.mxu1 }
 0x17b   :  { %v1136_v18 = vsel %vm100_vm4, %v2988_v48, %v2992_v27  ;;  %v205_v51 = vadd.f32 %v204_v59, %v148_v33  ;;  %v225_v57 = vadd.f32 %v224_v54, %v168_v47 }
 0x17c   :  { %1158 = vmatpush.msra.mxu0 %v1136_v18  ;;  %v1196_v9 = vsel %vm100_vm4, %v2982_v40, %v2983_v41  ;;  %v1197_v63 = vsel %vm100_vm4, %v2983_v41, %v2987_v37 }
 0x17d   :  { %2752 = vmatmul.msk.f32.vlgmr.msra.gmra.mxu0 %vm127_vm10, %v3765_v26  ;;  %1218 = vmatpush.msra.mxu2 %v1196_v9 }
 0x17e   :  { %1238 = vmatpush.msra.mxu3 %v1197_v63  ;;  %2755 = vmatmul.msk.f32.vlgmr.msra.gmra.mxu2 %vm127_vm10, %v3777_v62 }
 0x17f   :  { %2756 = vmatmul.msk.f32.vlgmr.msra.gmra.mxu3 %vm127_vm10, %v3777_v62 }
 0x180   :  { %v3787_v0 = vpop.permute.xlu1 %1267 }
 0x185   :  { %v263_v2 = vpop.f32.mrf.mxu0 }
 0x186   :  { %v283_v4 = vpop.f32.mrf.mxu1  ;;  %v286_v46 = vadd.f32 %v263_v2, %v205_v51 }
 0x187   :  { %v287_v6 = vadd.f32 %v283_v4, %v225_v57  ;;  %v2529_v57 = vld [vmem:[%s4022_s7] sm:$0x3]  ;;  %s2689_s7 = sshll.u32 %s4025_s10, 4  ;;  %s2690_s7 = int_to_ptr.hbm [resolvable:$true] %s2689_s7 }
 0x188   :  { %v3791_v17 = vpop.permute.xlu1 %2997  ;;  %2532 = vperm.xlu1 %2995, %v2529_v57  }
 0x189   :  { %v2999_v30 = vunpack.i.l.bf16 %v3791_v17  ;;  %v323_v36 = vpop.f32.mrf.mxu2 }
 0x18a   :  { %v346_v58 = vadd.f32 %v323_v36, %v286_v46  ;;  %v3018_v46 = vpop.permute.xlu2 %3017 }
 0x18b   :  { %v3798_v32 = vsel %vm122_vm9, %v3015_v44, %v2999_v30  ;;  %v343_v19 = vpop.f32.mrf.mxu3 }
 0x18c   :  { %v347_v24 = vadd.f32 %v343_v19, %v287_v6 }
 0x18d   :  { %v401_v16 = vpop.f32.mrf.mxu0 }
 0x18e   :  { %v421_v13 = vpop.f32.mrf.mxu1  ;;  %v424_v7 = vadd.f32 %v401_v16, %v346_v58 }
 0x18f   :  { %v425_v55 = vadd.f32 %v421_v13, %v347_v24 }
 0x191   :  { %v461_v61 = vpop.f32.mrf.mxu2 }
 0x192   :  { %v484_v22 = vadd.f32 %v461_v61, %v424_v7 }
 0x193   :  { %v481_v29 = vpop.f32.mrf.mxu3 }
 0x194   :  { %v485_v23 = vadd.f32 %v481_v29, %v425_v55 }
 0x195   :  { %v537_v52 = vpop.f32.mrf.mxu0 }
 0x196   :  { %v557_v11 = vpop.f32.mrf.mxu1  ;;  %v560_v21 = vadd.f32 %v537_v52, %v484_v22  ;;  %v3803_v22 = vpop.permute.xlu1 %3007 }
 0x197   :  { %v561_v27 = vadd.f32 %v557_v11, %v485_v23 }
 0x199   :  { %v597_v8 = vpop.f32.mrf.mxu2 }
 0x19a   :  { %v620_v39 = vadd.f32 %v597_v8, %v560_v21 }
 0x19b   :  { %v617_v56 = vpop.f32.mrf.mxu3 }
 0x19c   :  { %v621_v48 = vadd.f32 %v617_v56, %v561_v27  ;;  %v1255_v27 = vld [vmem:[%s4017_s2] sm:$0x3] }
 0x19d   :  { %v644_v5 = vpop.f32.mrf.mxu0 }
 0x19e   :  { %v664_v20 = vpop.f32.mrf.mxu1  ;;  %v667_v34 = vadd.f32 %v644_v5, %v620_v39  ;;  %v3023_v5 = vpop.permute.xlu2 %3022 }
 0x19f   :  { %v668_v40 = vadd.f32 %v664_v20, %v621_v48  ;;  %v1249_v39 = vpop.permute.xlu0 %1248 }
 0x1a1   :  { %v691_v28 = vpop.f32.mrf.mxu2 }
 0x1a2   :  { %v714_v9 = vadd.f32 %v691_v28, %v667_v34  ;;  %v1257_v34 = vperm.slane %v1255_v27, 0 }
 0x1a3   :  { %v711_v31 = vpop.f32.mrf.mxu3 }
 0x1a4   :  { %v715_v30 = vadd.f32 %v711_v31, %v668_v40  ;;  %v1258_v40 = vperm.slane %v1255_v27, 1 }
 0x1a7   :  { %v771_v37 = vpop.f32.mrf.mxu0  ;;  %v791_v41 = vpop.f32.mrf.mxu1 }
 0x1a8   :  { %v794_v33 = vadd.f32 %v771_v37, %v714_v9  ;;  %v795_v47 = vadd.f32 %v791_v41, %v715_v30  ;;  %v3010_v9 = vunpack.i.h.bf16 %v3803_v22  ;;  %v3025_v30 = vunpack.i.h.bf16 %v3023_v5 }
 0x1a9   :  { %v831_v18 = vpop.f32.mrf.mxu2 }
 0x1aa   :  { %v854_v2 = vadd.f32 %v831_v18, %v794_v33  ;;  %v3024_v18 = vunpack.i.l.bf16 %v3023_v5  ;;  %v3000_v33 = vunpack.i.h.bf16 %v3791_v17  ;;  %v3133_v5 = vld [vmem:[%s4015_s0 + $0x10] sm:$0xff] }
 0x1ab   :  { %v851_v63 = vpop.f32.mrf.mxu3 }
 0x1ac   :  { %v855_v4 = vadd.f32 %v851_v63, %v795_v47 }
 0x1af   :  { %v905_v59 = vpop.f32.mrf.mxu0  ;;  %v925_v54 = vpop.f32.mrf.mxu1 }
 0x1b0   :  { %v928_v16 = vadd.f32 %v905_v59, %v854_v2  ;;  %v929_v13 = vadd.f32 %v925_v54, %v855_v4  ;;  %v3020_v59 = vunpack.i.h.bf16 %v3018_v46  ;;  %v3019_v54 = vunpack.i.l.bf16 %v3018_v46  ;;  %v1263_v4 = vld [vmem:[%s4021_s6] sm:$0x3] }
 0x1b1   :  { %v965_v36 = vpop.f32.mrf.mxu2 }
 0x1b2   :  { %v988_v61 = vadd.f32 %v965_v36, %v928_v16  ;;  %v1565_v16 = vsel %vm238_vm11, %v3010_v9, %v3024_v18  ;;  %v1452_v17 = vsel %vm122_vm9, %v3000_v33, %v3019_v54  ;;  %v1453_v57 = vsel %vm122_vm9, %v3019_v54, %v3020_v59 }
 0x1b3   :  { %v985_v19 = vpop.f32.mrf.mxu3 }
 0x1b4   :  { %v989_v6 = vadd.f32 %v985_v19, %v929_v13  ;;  %v3817_v19 = vpop.permute.xlu1 %3027  ;;  %v3038_v13 = vpop.permute.xlu2 %3037 }
 0x1b5   :  { %v3039_v46 = vunpack.i.l.bf16 %v3038_v13 }
 0x1b7   :  { %v1026_v51 = vpop.f32.mrf.mxu0  ;;  %v1046_v29 = vpop.f32.mrf.mxu1 }
 0x1b8   :  { %v1049_v58 = vadd.f32 %v1026_v51, %v988_v61  ;;  %v1050_v24 = vadd.f32 %v1046_v29, %v989_v6  ;;  %v1566_v51 = vsel %vm238_vm11, %v3024_v18, %v3025_v30  ;;  %v3030_v61 = vunpack.i.h.bf16 %v3817_v19 }
 0x1b9   :  { %v1086_v52 = vpop.f32.mrf.mxu2  ;;  %v3040_v29 = vunpack.i.h.bf16 %v3038_v13 }
 0x1ba   :  { %v1109_v7 = vadd.f32 %v1086_v52, %v1049_v58  ;;  %v1689_v6 = vsel %vm376_vm8, %v3030_v61, %v3039_v46 }
 0x1bb   :  { %v1106_v11 = vpop.f32.mrf.mxu3  ;;  %v1690_v58 = vsel %vm376_vm8, %v3039_v46, %v3040_v29  ;;  %v3014_v46 = vunpack.i.l.bf16 %v3789_v15  ;;  %v1441_v15 = vld [vmem:[%s4018_s3] sm:$0xff] }
 0x1bc   :  { %v1110_v55 = vadd.f32 %v1106_v11, %v1050_v24  ;;  %v3831_v52 = vpop.permute.xlu1 %3047  ;;  %v3053_v11 = vpop.permute.xlu2 %3052 }
 0x1bd   :  { %v3050_v24 = vunpack.i.h.bf16 %v3831_v52 }
 0x1e3   :  { %v1180_v56 = vpop.f32.mrf.mxu1 }
 0x1e4   :  { %v1184_v20 = vadd.f32 %v1180_v56, %v1110_v55  ;;  %v3843_v55 = vpop.permute.xlu1 %3057 }
 0x1fa   :  { %v1160_v8 = vpop.f32.mrf.mxu0 }
 0x1fb   :  { %v1183_v23 = vadd.f32 %v1160_v8, %v1109_v7  ;;  %v3055_v8 = vunpack.i.h.bf16 %v3053_v11  ;;  %v3054_v7 = vunpack.i.l.bf16 %v3053_v11  ;;  %v3904_v11 = vld [vmem:[%s4023_s8] sm:$0xff] }
 0x1fd   :  { %v1813_v56 = vsel %vm512_vm7, %v3050_v24, %v3054_v7 }
 0x201   :  { %v1220_v21 = vpop.f32.mrf.mxu2 }
 0x202   :  { %v1243_v28 = vadd.f32 %v1220_v21, %v1183_v23  ;;  %v1240_v31 = vpop.f32.mrf.mxu3  ;;  %v3073_v23 = vpop.permute.xlu2 %3072 }
 0x203   :  { %v1244_v48 = vadd.f32 %v1240_v31, %v1184_v20  ;;  %v3060_v20 = vunpack.i.h.bf16 %v3843_v55  ;;  %v3075_v21 = vunpack.i.h.bf16 %v3073_v23  ;;  %v3074_v27 = vunpack.i.l.bf16 %v3073_v23 }
 0x204   :  { %v1251_v37 = vadd.f32 %v1249_v39, %v1243_v28  ;;  %v3856_v28 = vpop.permute.xlu1 %3062 }
 0x205   :  { %v1252_v41 = vadd.f32 %v1249_v39, %v1244_v48  ;;  %v2036_v39 = vsel %vm490_vm6, %v3074_v27, %v3075_v21  ;;  %v3065_v48 = vunpack.i.h.bf16 %v3856_v28 }
 0x206   :  { %v1253_v63 = vmax.f32 %v1251_v37, 0.0 }
 0x207   :  { %v1254_v47 = vmax.f32 %v1252_v41, 0.0 }
 0x208   :  { %v3810_v2 = vmul.f32 %v1257_v34, %v1253_v63 }
 0x209   :  { %v3815_v36 = vmul.f32 %v1258_v40, %v1254_v47 }
 0x20a   :  { %1288 = vmatpush.msrb.mxu0 %v3810_v2  ;;  %v3093_v31 = vpop.permute.xlu2 %3092 }
 0x20b   :  { %1308 = vmatpush.msrb.mxu1 %v3815_v36  ;;  %2757 = vmatmul.msk.f32.vlgmr.msrb.gmra.mxu0 %vm127_vm10, %v1263_v4  ;;  %v3095_v37 = vunpack.i.h.bf16 %v3093_v31  ;;  %v3094_v34 = vunpack.i.l.bf16 %v3093_v31 }
 0x20c   :  { %2758 = vmatmul.msk.f32.vlgmr.msrb.gmra.mxu1 %vm127_vm10, %v1263_v4  ;;  %1474 = vmatpush.msra.mxu0 %v1452_v17  ;;  %v3865_v41 = vpop.permute.xlu1 %3087 }
 0x20d   :  { %1494 = vmatpush.msra.mxu1 %v1453_v57  ;;  %v2159_v18 = vsel %vm354_vm5, %v3065_v48, %v3094_v34  ;;  %v3090_v63 = vunpack.i.h.bf16 %v3865_v41 }
 0x20e   :  { %1587 = vmatpush.msrb.mxu0 %v1565_v16 }
 0x20f   :  { %1607 = vmatpush.msrb.mxu1 %v1566_v51 }
 0x212   :  { %v3098_v40 = vpop.permute.xlu2 %3097 }
 0x213   :  { %2769 = vmatmul.msk.f32.vlgmr.msra.gmra.mxu0 %vm127_vm10, %v3475_v1  ;;  %v3099_v9 = vunpack.i.l.bf16 %v3098_v40  ;;  %v3100_v30 = vunpack.i.h.bf16 %v3098_v40 }
 0x214   :  { %2770 = vmatmul.msk.f32.vlgmr.msra.gmra.mxu1 %vm127_vm10, %v3475_v1  ;;  %1711 = vmatpush.msra.mxu0 %v1689_v6  ;;  %v1814_v1 = vsel %vm512_vm7, %v3054_v7, %v3055_v8  ;;  %v3878_v59 = vpop.permute.xlu1 %3107  ;;  %v3009_v6 = vunpack.i.l.bf16 %v3803_v22 }
 0x215   :  { %1731 = vmatpush.msra.mxu1 %v1690_v58  ;;  %v2277_v33 = vsel %vm1001_vm12, %v3090_v63, %v3099_v9  ;;  %v2278_v47 = vsel %vm1001_vm12, %v3099_v9, %v3100_v30  ;;  %v3110_v54 = vunpack.i.h.bf16 %v3878_v59  ;;  %v3089_v30 = vunpack.i.l.bf16 %v3865_v41 }
 0x21b   :  { %2774 = vmatmul.msk.f32.vlgmr.msrb.gmra.mxu0 %vm127_vm10, %v3518_v14 }
 0x21c   :  { %2775 = vmatmul.msk.f32.vlgmr.msrb.gmra.mxu1 %vm127_vm10, %v3518_v14  ;;  %1835 = vmatpush.msrb.mxu0 %v1813_v56  ;;  %v3134_v14 = vld [vmem:[%s4015_s0 + $0x18] sm:$0xff] }
 0x21d   :  { %1855 = vmatpush.msrb.mxu1 %v1814_v1  ;;  %v3029_v1 = vunpack.i.l.bf16 %v3817_v19 }
 0x223   :  { %2780 = vmatmul.msk.f32.vlgmr.msra.gmra.mxu0 %vm127_vm10, %v3557_v45 }
 0x224   :  { %2781 = vmatmul.msk.f32.vlgmr.msra.gmra.mxu1 %vm127_vm10, %v3557_v45  ;;  %1940 = vmatpush.msra.mxu0 %v3133_v5  ;;  %v2035_v45 = vsel %vm490_vm6, %v3060_v20, %v3074_v27  ;;  %v3049_v20 = vunpack.i.l.bf16 %v3831_v52  ;;  %v3135_v52 = vld [vmem:[%s4016_s1 + $0x10] sm:$0xff] }
 0x225   :  { %1960 = vmatpush.msra.mxu1 %v3134_v14 }
 0x22b   :  { %2786 = vmatmul.msk.f32.vlgmr.msrb.gmra.mxu0 %vm127_vm10, %v3588_v25 }
 0x22c   :  { %2787 = vmatmul.msk.f32.vlgmr.msrb.gmra.mxu1 %vm127_vm10, %v3588_v25  ;;  %2057 = vmatpush.msrb.mxu0 %v2035_v45  ;;  %v2160_v25 = vsel %vm354_vm5, %v3094_v34, %v3095_v37 }
 0x22d   :  { %2077 = vmatpush.msrb.mxu1 %v2036_v39  ;;  %v3059_v39 = vunpack.i.l.bf16 %v3843_v55 }
 0x233   :  { %2792 = vmatmul.msk.f32.vlgmr.msra.gmra.mxu0 %vm127_vm10, %v3621_v12 }
 0x234   :  { %2793 = vmatmul.msk.f32.vlgmr.msra.gmra.mxu1 %vm127_vm10, %v3621_v12  ;;  %2181 = vmatpush.msra.mxu0 %v2159_v18  ;;  %v3113_v12 = vpop.permute.xlu2 %3112  ;;  %v3064_v18 = vunpack.i.l.bf16 %v3856_v28 }
 0x235   :  { %2201 = vmatpush.msra.mxu1 %v2160_v25  ;;  %v3115_v4 = vunpack.i.h.bf16 %v3113_v12  ;;  %v3114_v16 = vunpack.i.l.bf16 %v3113_v12 }
 0x237   :  { %v2401_v13 = vsel %vm100_vm4, %v3110_v54, %v3114_v16  ;;  %v2402_v17 = vsel %vm100_vm4, %v3114_v16, %v3115_v4  ;;  %v3109_v54 = vunpack.i.l.bf16 %v3878_v59 }
 0x23b   :  { %2798 = vmatmul.msk.f32.vlgmr.msrb.gmra.mxu0 %vm127_vm10, %v3657_v53 }
 0x23c   :  { %2799 = vmatmul.msk.f32.vlgmr.msrb.gmra.mxu1 %vm127_vm10, %v3657_v53  ;;  %2299 = vmatpush.msrb.mxu0 %v2277_v33  ;;  %v3003_v53 = vpop.permute.xlu0 %3002  ;;  %v1320_v16 = vpop.permute.xlu2 %1319 }
 0x23d   :  { %2319 = vmatpush.msrb.mxu1 %v2278_v47  ;;  %v3005_v57 = vunpack.i.h.bf16 %v3003_v53 }
 0x23f   :  { %v1625_v22 = vsel %vm238_vm11, %v3005_v57, %v3009_v6 }
 0x243   :  { %2804 = vmatmul.msk.f32.vlgmr.msra.gmra.mxu0 %vm127_vm10, %v3691_v49 }
 0x244   :  { %2805 = vmatmul.msk.f32.vlgmr.msra.gmra.mxu1 %vm127_vm10, %v3691_v49  ;;  %2423 = vmatpush.msra.mxu0 %v2401_v13  ;;  %v3004_v49 = vunpack.i.l.bf16 %v3003_v53  ;;  %v3033_v24 = vpop.permute.xlu0 %3032 }
 0x245   :  { %2443 = vmatpush.msra.mxu1 %v2402_v17  ;;  %v3035_v7 = vunpack.i.h.bf16 %v3033_v24  ;;  %v3034_v56 = vunpack.i.l.bf16 %v3033_v24 }
 0x246   :  { %v1624_v8 = vsel %vm238_vm11, %v3004_v49, %v3005_v57 }
 0x24b   :  { %2810 = vmatmul.msk.f32.vlgmr.msrb.gmra.mxu0 %vm127_vm10, %v3725_v3 }
 0x24c   :  { %2811 = vmatmul.msk.f32.vlgmr.msrb.gmra.mxu1 %vm127_vm10, %v3725_v3  ;;  %v3043_v23 = vpop.permute.xlu0 %3042 }
 0x24d   :  { %v3045_v5 = vunpack.i.h.bf16 %v3043_v23  ;;  %v3044_v14 = vunpack.i.l.bf16 %v3043_v23 }
 0x24f   :  { %v1872_v19 = vsel %vm512_vm7, %v3044_v14, %v3045_v5  ;;  %v1873_v21 = vsel %vm512_vm7, %v3045_v5, %v3049_v20 }
 0x253   :  { %2816 = vmatmul.msk.f32.vlgmr.msra.gmra.mxu0 %vm127_vm10, %v3765_v26 }
 0x254   :  { %2817 = vmatmul.msk.f32.vlgmr.msra.gmra.mxu1 %vm127_vm10, %v3765_v26  ;;  %v3068_v27 = vpop.permute.xlu0 %3067 }
 0x255   :  { %v3070_v31 = vunpack.i.h.bf16 %v3068_v27  ;;  %v3069_v45 = vunpack.i.l.bf16 %v3068_v27 }
 0x257   :  { %v2095_v37 = vsel %vm490_vm6, %v3070_v31, %v3059_v39 }
 0x25c   :  { %v3078_v48 = vpop.permute.xlu0 %3077 }
 0x25d   :  { %v3080_v34 = vunpack.i.h.bf16 %v3078_v48  ;;  %v3079_v40 = vunpack.i.l.bf16 %v3078_v48 }
 0x25f   :  { %v2218_v55 = vsel %vm354_vm5, %v3079_v40, %v3080_v34 }
 0x264   :  { %v3083_v25 = vpop.permute.xlu0 %3082 }
 0x265   :  { %v3085_v9 = vunpack.i.h.bf16 %v3083_v25  ;;  %v3084_v63 = vunpack.i.l.bf16 %v3083_v25 }
 0x267   :  { %v2336_v33 = vsel %vm1001_vm12, %v3084_v63, %v3085_v9  ;;  %v2337_v28 = vsel %vm1001_vm12, %v3085_v9, %v3089_v30  ;;  %v1413_v9 = vld [vmem:[%s4015_s0] sm:$0xff] }
 0x26c   :  { %v3103_v47 = vpop.permute.xlu0 %3102 }
 0x26d   :  { %v3104_v12 = vunpack.i.l.bf16 %v3103_v47 }
 0x288   :  { %v1290_v51 = vpop.f32.mrf.mxu0 }
 0x289   :  { %v1291_v61 = vadd.f32 %v1290_v51, %v3787_v0  ;;  %v1310_v29 = vpop.f32.mrf.mxu1 }
 0x28a   :  { %v1311_v58 = vadd.f32 %v1310_v29, %v3787_v0  ;;  %v1508_v0 = vsel %vm122_vm9, %v3014_v46, %v3015_v44  ;;  %v1748_v44 = vsel %vm376_vm8, %v3034_v56, %v3035_v7 }
 0x28b   :  { %v1313_v3 = vmax.f32 %v1291_v61, 0.0 }
 0x28c   :  { %v1314_v26 = vmax.f32 %v1311_v58, 0.0 }
 0x28d   :  { %2759 = vmatpush.msk.msrb.mxu2 %vm1326_vm13, %v1313_v3 }
 0x28e   :  { %2761 = vmatpush.msk.msrb.mxu3 %vm1326_vm13, %v1314_v26  ;;  %2760 = vmatmul.msk.f32.vlgmr.msrb.gmra.mxu2 %vm1322_vm14, %v3904_v11 }
 0x28f   :  { %2762 = vmatmul.msk.f32.vlgmr.msrb.gmra.mxu3 %vm1322_vm14, %v3904_v11  ;;  %1530 = vmatpush.msra.mxu2 %v1508_v0 }
 0x290   :  { %1550 = vmatpush.msra.mxu3 %v3798_v32  ;;  %v1749_v32 = vsel %vm376_vm8, %v3035_v7, %v3029_v1 }
 0x291   :  { %1646 = vmatpush.msrb.mxu2 %v1624_v8  ;;  %v1496_v59 = vpop.f32.mrf.mxu1 }
 0x292   :  { %1666 = vmatpush.msrb.mxu3 %v1625_v22 }
 0x296   :  { %2771 = vmatmul.msk.f32.vlgmr.msra.gmra.mxu2 %vm127_vm10, %v1441_v15 }
 0x297   :  { %2772 = vmatmul.msk.f32.vlgmr.msra.gmra.mxu3 %vm127_vm10, %v1441_v15  ;;  %1770 = vmatpush.msra.mxu2 %v1748_v44 }
 0x298   :  { %1790 = vmatpush.msra.mxu3 %v1749_v32 }
 0x299   :  { %v1609_v13 = vpop.f32.mrf.mxu1 }
 0x29e   :  { %2777 = vmatmul.msk.f32.vlgmr.msrb.gmra.mxu2 %vm127_vm10, %v3513_v10 }
 0x29f   :  { %2778 = vmatmul.msk.f32.vlgmr.msrb.gmra.mxu3 %vm127_vm10, %v3513_v10  ;;  %1894 = vmatpush.msrb.mxu2 %v1872_v19  ;;  %v3136_v10 = vld [vmem:[%s4016_s1 + $0x18] sm:$0xff] }
 0x2a0   :  { %1914 = vmatpush.msrb.mxu3 %v1873_v21 }
 0x2a1   :  { %v1733_v6 = vpop.f32.mrf.mxu1 }
 0x2a6   :  { %2783 = vmatmul.msk.f32.vlgmr.msra.gmra.mxu2 %vm127_vm10, %v3552_v42 }
 0x2a7   :  { %2784 = vmatmul.msk.f32.vlgmr.msra.gmra.mxu3 %vm127_vm10, %v3552_v42  ;;  %1986 = vmatpush.msra.mxu2 %v3135_v52  ;;  %v2094_v42 = vsel %vm490_vm6, %v3069_v45, %v3070_v31 }
 0x2a8   :  { %2006 = vmatpush.msra.mxu3 %v3136_v10 }
 0x2a9   :  { %v1857_v22 = vpop.f32.mrf.mxu1 }
 0x2ae   :  { %2789 = vmatmul.msk.f32.vlgmr.msrb.gmra.mxu2 %vm127_vm10, %v3583_v43 }
 0x2af   :  { %2790 = vmatmul.msk.f32.vlgmr.msrb.gmra.mxu3 %vm127_vm10, %v3583_v43  ;;  %2116 = vmatpush.msrb.mxu2 %v2094_v42  ;;  %v2219_v43 = vsel %vm354_vm5, %v3080_v34, %v3064_v18 }
 0x2b0   :  { %2136 = vmatpush.msrb.mxu3 %v2095_v37 }
 0x2b1   :  { %v1962_v18 = vpop.f32.mrf.mxu1 }
 0x2b6   :  { %2795 = vmatmul.msk.f32.vlgmr.msra.gmra.mxu2 %vm127_vm10, %v3616_v38 }
 0x2b7   :  { %2796 = vmatmul.msk.f32.vlgmr.msra.gmra.mxu3 %vm127_vm10, %v3616_v38  ;;  %2240 = vmatpush.msra.mxu2 %v2218_v55  ;;  %v3105_v38 = vunpack.i.h.bf16 %v3103_v47 }
 0x2b8   :  { %2260 = vmatpush.msra.mxu3 %v2219_v43 }
 0x2b9   :  { %v2460_v41 = vsel %vm100_vm4, %v3104_v12, %v3105_v38  ;;  %v2461_v4 = vsel %vm100_vm4, %v3105_v38, %v3109_v54 }
 0x2be   :  { %2801 = vmatmul.msk.f32.vlgmr.msrb.gmra.mxu2 %vm127_vm10, %v3648_v50 }
 0x2bf   :  { %2802 = vmatmul.msk.f32.vlgmr.msrb.gmra.mxu3 %vm127_vm10, %v3648_v50  ;;  %2358 = vmatpush.msrb.mxu2 %v2336_v33  ;;  %v1476_v50 = vpop.f32.mrf.mxu0 }
 0x2c0   :  { %2378 = vmatpush.msrb.mxu3 %v2337_v28  ;;  %v1414_v28 = vld [vmem:[%s4015_s0 + $0x8] sm:$0xff] }
 0x2c6   :  { %2807 = vmatmul.msk.f32.vlgmr.msra.gmra.mxu2 %vm127_vm10, %v3682_v60 }
 0x2c7   :  { %2808 = vmatmul.msk.f32.vlgmr.msra.gmra.mxu3 %vm127_vm10, %v3682_v60  ;;  %2482 = vmatpush.msra.mxu2 %v2460_v41  ;;  %v1589_v60 = vpop.f32.mrf.mxu0 }
 0x2c8   :  { %2502 = vmatpush.msra.mxu3 %v2461_v4 }
 0x2ce   :  { %2813 = vmatmul.msk.f32.vlgmr.msrb.gmra.mxu2 %vm127_vm10, %v3708_v35 }
 0x2cf   :  { %2814 = vmatmul.msk.f32.vlgmr.msrb.gmra.mxu3 %vm127_vm10, %v3708_v35  ;;  %v1713_v29 = vpop.f32.mrf.mxu0 }
 0x2d6   :  { %2819 = vmatmul.msk.f32.vlgmr.msra.gmra.mxu2 %vm127_vm10, %v3777_v62 }
 0x2d7   :  { %2820 = vmatmul.msk.f32.vlgmr.msra.gmra.mxu3 %vm127_vm10, %v3777_v62  ;;  %v1837_v0 = vpop.f32.mrf.mxu0 }
 0x2df   :  { %v1942_v42 = vpop.f32.mrf.mxu0 }
 0x311   :  { %v1350_v17 = vpop.f32.mrf.mxu2 }
 0x312   :  { %v1351_v53 = vadd.f32 %v1350_v17, %v1320_v16  ;;  %v1370_v51 = vpop.f32.mrf.mxu3 }
 0x313   :  { %v1371_v57 = vadd.f32 %v1370_v51, %v1320_v16 }
 0x314   :  { %v2763_v49 = vmul.f32 -1.442695, %v1351_v53 }
 0x315   :  { %v2764_v61 = vmul.f32 -1.442695, %v1371_v57 }
 0x316   :  { %3117 = vpow2.f32 %v2763_v49 }
 0x317   :  { %3119 = vpow2.f32 %v2764_v61 }
 0x319   :  { %v1532_v35 = vpop.f32.mrf.mxu2 }
 0x31a   :  { %v1552_v46 = vpop.f32.mrf.mxu3  ;;  %v1533_v5 = vadd.f32 %v1532_v35, %v1476_v50 }
 0x31b   :  { %v1553_v31 = vadd.f32 %v1552_v46, %v1496_v59 }
 0x31c   :  { %v3118_v58 = vpop.eup %3117  ;;  %v1612_v40 = vadd.f32 %v1589_v60, %v1533_v5 }
 0x31d   :  { %v3120_v3 = vpop.eup %3119  ;;  %v1379_v62 = vadd.f32 1.0, %v3118_v58  ;;  %v1613_v43 = vadd.f32 %v1609_v13, %v1553_v31  ;;  %v2079_v13 = vpop.f32.mrf.mxu1 }
 0x31e   :  { %v1380_v26 = vadd.f32 1.0, %v3120_v3 }
 0x31f   :  { %3121 = vrcp.f32 %v1379_v62  ;;  %v1392_v23 = vand.u32 2147483648, %v1379_v62  ;;  %v1390_v19 = vand.u32 2147483647, %v1379_v62  ;;  %vm1386_vm1 = vweird.f32 %v1379_v62 }
 0x320   :  { %3123 = vrcp.f32 %v1380_v26  ;;  %v1407_v21 = vand.u32 2147483648, %v1380_v26  ;;  %v1405_v10 = vand.u32 2147483647, %v1380_v26  ;;  %vm1401_vm3 = vweird.f32 %v1380_v26 }
 0x321   :  { %v1648_v24 = vpop.f32.mrf.mxu2  ;;  %v1393_v39 = vor.u32 1.1754944e-38, %v1392_v23  ;;  %vm1391_vm4 = vcmp.eq.f32.partialorder %v1390_v19, 8.507059e+37 }
 0x322   :  { %v1668_v8 = vpop.f32.mrf.mxu3  ;;  %v1408_v34 = vor.u32 1.1754944e-38, %v1407_v21  ;;  %vm1406_vm6 = vcmp.eq.f32.partialorder %v1405_v10, 8.507059e+37  ;;  %v1671_v33 = vadd.f32 %v1648_v24, %v1612_v40 }
 0x323   :  { %v1672_v38 = vadd.f32 %v1668_v8, %v1613_v43 }
 0x324   :  { %v1736_v50 = vadd.f32 %v1713_v29, %v1671_v33  ;;  %v2528_v33 = vld [vmem:[%s4021_s6] sm:$0x3] }
 0x325   :  { %v3122_v7 = vpop.eup %3121  ;;  %v1737_v59 = vadd.f32 %v1733_v6, %v1672_v38  ;;  %v2203_v29 = vpop.f32.mrf.mxu1 }
 0x326   :  { %v3124_v56 = vpop.eup %3123  ;;  %v1382_v1 = vmul.f32 %v3122_v7, %v1379_v62  ;;  %vm1387_vm15 = vweird.f32 %v3122_v7 }
 0x327   :  { %v1397_v15 = vmul.f32 %v3124_v56, %v1380_v26  ;;  %vm1402_vm0 = vweird.f32 %v3124_v56  ;;  %vm1388_vm2 = vmor %vm1386_vm1, %vm1387_vm15 }
 0x328   :  { %v1383_v44 = vsub.f32 1.0, %v1382_v1  ;;  %vm1403_vm5 = vmor %vm1401_vm3, %vm1402_vm0 }
 0x329   :  { %v1398_v32 = vsub.f32 1.0, %v1397_v15  ;;  %v1772_v14 = vpop.f32.mrf.mxu2 }
 0x32a   :  { %v1384_v20 = vmul.f32 %v3122_v7, %v1383_v44  ;;  %v1792_v27 = vpop.f32.mrf.mxu3  ;;  %v1795_v16 = vadd.f32 %v1772_v14, %v1736_v50 }
 0x32b   :  { %v1399_v52 = vmul.f32 %v3124_v56, %v1398_v32  ;;  %v1796_v60 = vadd.f32 %v1792_v27, %v1737_v59 }
 0x32c   :  { %v1385_v45 = vadd.f32 %v3122_v7, %v1384_v20  ;;  %v1860_v53 = vadd.f32 %v1837_v0, %v1795_v16 }
 0x32d   :  { %v1400_v48 = vadd.f32 %v3124_v56, %v1399_v52  ;;  %v1861_v57 = vadd.f32 %v1857_v22, %v1796_v60  ;;  %v2321_v44 = vpop.f32.mrf.mxu1 }
 0x32e   :  { %v1389_v37 = vsel %vm1388_vm2, %v3122_v7, %v1385_v45 }
 0x32f   :  { %v1394_v25 = vsel %vm1391_vm4, %v1393_v39, %v1389_v37  ;;  %v1404_v55 = vsel %vm1403_vm5, %v3124_v56, %v1400_v48  ;;  %v2821_v48 = vld [vmem:[%s4017_s2 + $0x2] sm:$0x3] }
 0x330   :  { %v1411_v63 = vmul.f32 %v1394_v25, %v3810_v2  ;;  %v1409_v30 = vsel %vm1406_vm6, %v1408_v34, %v1404_v55  ;;  %v2059_v2 = vpop.f32.mrf.mxu0  ;;  %v2513_v34 = vpop.permute.xlu0 %2512  ;;  %v2522_v25 = vperm.slane %v2821_v48, 0  ;;  %v2523_v43 = vperm.slane %v2821_v48, 1 }
 0x331   :  { %v1412_v47 = vmul.f32 %v1409_v30, %v3815_v36  ;;  %v1896_v12 = vpop.f32.mrf.mxu2 }
 0x332   :  { %v1916_v54 = vpop.f32.mrf.mxu3  ;;  %v1415_v41 = vadd.f32 %v1413_v9, %v1411_v63  ;;  %v1919_v49 = vadd.f32 %v1896_v12, %v1860_v53 }
 0x333   :  { %v1416_v4 = vadd.f32 %v1414_v28, %v1412_v47  ;;  %v1920_v61 = vadd.f32 %v1916_v54, %v1861_v57  ;;  %v2533_v47 = vpop.permute.xlu1 %2532 }
 0x334   :  { %1417 = vst [vmem:[#allocation3] sm:$0xff] %v1415_v41  ;;  %v1965_v36 = vadd.f32 %v1942_v42, %v1919_v49 }
 0x335   :  { %1418 = vst [vmem:[#allocation3 + $0x8] sm:$0xff] %v1416_v4  ;;  %v1966_v35 = vadd.f32 %v1962_v18, %v1920_v61  ;;  %v2445_v10 = vpop.f32.mrf.mxu1 }
 0x338   :  { %v2183_v58 = vpop.f32.mrf.mxu0  ;;  %v2585_v59 = vpop.permute.xlu0 %2584 }
 0x339   :  { %v1988_v17 = vpop.f32.mrf.mxu2 }
 0x33a   :  { %v2008_v51 = vpop.f32.mrf.mxu3  ;;  %v2011_v3 = vadd.f32 %v1988_v17, %v1965_v36 }
 0x33b   :  { %v2012_v26 = vadd.f32 %v2008_v51, %v1966_v35 }
 0x33c   :  { %v2082_v6 = vadd.f32 %v2059_v2, %v2011_v3 }
 0x33d   :  { %v2083_v24 = vadd.f32 %v2079_v13, %v2012_v26 }
 0x340   :  { %v2301_v15 = vpop.f32.mrf.mxu0 }
 0x341   :  { %v2118_v46 = vpop.f32.mrf.mxu2 }
 0x342   :  { %v2138_v62 = vpop.f32.mrf.mxu3  ;;  %v2141_v8 = vadd.f32 %v2118_v46, %v2082_v6 }
 0x343   :  { %v2142_v7 = vadd.f32 %v2138_v62, %v2083_v24 }
 0x344   :  { %v2206_v0 = vadd.f32 %v2183_v58, %v2141_v8 }
 0x345   :  { %v2207_v22 = vadd.f32 %v2203_v29, %v2142_v7 }
 0x348   :  { %v2425_v52 = vpop.f32.mrf.mxu0 }
 0x349   :  { %v2242_v56 = vpop.f32.mrf.mxu2 }
 0x34a   :  { %v2262_v1 = vpop.f32.mrf.mxu3  ;;  %v2265_v23 = vadd.f32 %v2242_v56, %v2206_v0 }
 0x34b   :  { %v2266_v32 = vadd.f32 %v2262_v1, %v2207_v22 }
 0x34c   :  { %v2324_v14 = vadd.f32 %v2301_v15, %v2265_v23  ;;  %v2830_v23 = vld [vmem:[%s4015_s0 + $0x10] sm:$0xff] }
 0x34d   :  { %v2325_v19 = vadd.f32 %v2321_v44, %v2266_v32 }
 0x351   :  { %v2360_v5 = vpop.f32.mrf.mxu2 }
 0x352   :  { %v2380_v20 = vpop.f32.mrf.mxu3  ;;  %v2383_v21 = vadd.f32 %v2360_v5, %v2324_v14  ;;  %v2831_v14 = vld [vmem:[%s4015_s0 + $0x18] sm:$0xff] }
 0x353   :  { %v2384_v27 = vadd.f32 %v2380_v20, %v2325_v19 }
 0x354   :  { %v2448_v31 = vadd.f32 %v2425_v52, %v2383_v21 }
 0x355   :  { %v2449_v45 = vadd.f32 %v2445_v10, %v2384_v27 }
 0x359   :  { %v2484_v39 = vpop.f32.mrf.mxu2 }
 0x35a   :  { %v2507_v42 = vadd.f32 %v2484_v39, %v2448_v31  ;;  %v2504_v37 = vpop.f32.mrf.mxu3 }
 0x35b   :  { %v2508_v40 = vadd.f32 %v2504_v37, %v2449_v45 }
 0x35c   :  { %v2515_v18 = vadd.f32 %v2513_v34, %v2507_v42 }
 0x35d   :  { %v2516_v55 = vadd.f32 %v2513_v34, %v2508_v40 }
 0x35e   :  { %v2517_v9 = vmax.f32 %v2515_v18, 0.0 }
 0x35f   :  { %v2518_v63 = vmax.f32 %v2516_v55, 0.0 }
 0x360   :  { %v2526_v30 = vmul.f32 %v2522_v25, %v2517_v9 }
 0x361   :  { %v3993_v28 = vmul.f32 %v2523_v43, %v2518_v63 }
 0x362   :  { %2553 = vmatpush.msrb.mxu0 %v2526_v30 }
 0x363   :  { %2573 = vmatpush.msrb.mxu1 %v3993_v28  ;;  %2822 = vmatmul.msk.f32.vlgmr.msrb.gmra.mxu0 %vm127_vm10, %v2528_v33 }
 0x364   :  { %2823 = vmatmul.msk.f32.vlgmr.msrb.gmra.mxu1 %vm127_vm10, %v2528_v33 }
 0x3e0   :  { %v2555_v38 = vpop.f32.mrf.mxu0 }
 0x3e1   :  { %v2556_v12 = vadd.f32 %v2555_v38, %v2533_v47  ;;  %v2575_v54 = vpop.f32.mrf.mxu1 }
 0x3e2   :  { %v2576_v41 = vadd.f32 %v2575_v54, %v2533_v47 }
 0x3e3   :  { %v2578_v4 = vmax.f32 %v2556_v12, 0.0 }
 0x3e4   :  { %v2579_v50 = vmax.f32 %v2576_v41, 0.0 }
 0x3e5   :  { %2824 = vmatpush.msk.msrb.mxu2 %vm1326_vm13, %v2578_v4 }
 0x3e6   :  { %2826 = vmatpush.msk.msrb.mxu3 %vm1326_vm13, %v2579_v50  ;;  %2825 = vmatmul.msk.f32.vlgmr.msrb.gmra.mxu2 %vm1322_vm14, %v3904_v11 }
 0x3e7   :  { %2827 = vmatmul.msk.f32.vlgmr.msrb.gmra.mxu3 %vm1322_vm14, %v3904_v11 }
 0x469   :  { %v2613_v16 = vpop.f32.mrf.mxu2 }
 0x46a   :  { %v2614_v60 = vadd.f32 %v2613_v16, %v2585_v59  ;;  %v2633_v2 = vpop.f32.mrf.mxu3 }
 0x46b   :  { %v2634_v13 = vadd.f32 %v2633_v2, %v2585_v59 }
 0x46c   :  { %v2828_v17 = vmul.f32 -1.442695, %v2614_v60 }
 0x46d   :  { %v2829_v53 = vmul.f32 -1.442695, %v2634_v13 }
 0x46e   :  { %3125 = vpow2.f32 %v2828_v17 }
 0x46f   :  { %3127 = vpow2.f32 %v2829_v53 }
 0x474   :  { %v3126_v51 = vpop.eup %3125 }
 0x475   :  { %v3128_v57 = vpop.eup %3127  ;;  %v2642_v49 = vadd.f32 1.0, %v3126_v51 }
 0x476   :  { %v2643_v61 = vadd.f32 1.0, %v3128_v57 }
 0x477   :  { %3129 = vrcp.f32 %v2642_v49  ;;  %v2655_v3 = vand.u32 2147483648, %v2642_v49  ;;  %v2653_v26 = vand.u32 2147483647, %v2642_v49  ;;  %vm2649_vm9 = vweird.f32 %v2642_v49 }
 0x478   :  { %3131 = vrcp.f32 %v2643_v61  ;;  %v2670_v6 = vand.u32 2147483648, %v2643_v61  ;;  %v2668_v8 = vand.u32 2147483647, %v2643_v61  ;;  %vm2664_vm11 = vweird.f32 %v2643_v61 }
 0x479   :  { %v2656_v56 = vor.u32 1.1754944e-38, %v2655_v3  ;;  %vm2654_vm12 = vcmp.eq.f32.partialorder %v2653_v26, 8.507059e+37 }
 0x47a   :  { %v2671_v0 = vor.u32 1.1754944e-38, %v2670_v6  ;;  %vm2669_vm14 = vcmp.eq.f32.partialorder %v2668_v8, 8.507059e+37 }
 0x47d   :  { %v3130_v36 = vpop.eup %3129 }
 0x47e   :  { %v3132_v35 = vpop.eup %3131  ;;  %v2645_v46 = vmul.f32 %v3130_v36, %v2642_v49  ;;  %vm2650_vm7 = vweird.f32 %v3130_v36 }
 0x47f   :  { %v2660_v58 = vmul.f32 %v3132_v35, %v2643_v61  ;;  %vm2665_vm8 = vweird.f32 %v3132_v35  ;;  %vm2651_vm10 = vmor %vm2649_vm9, %vm2650_vm7 }
 0x480   :  { %v2646_v11 = vsub.f32 1.0, %v2645_v46  ;;  %vm2666_vm13 = vmor %vm2664_vm11, %vm2665_vm8 }
 0x481   :  { %v2661_v62 = vsub.f32 1.0, %v2660_v58 }
 0x482   :  { %v2647_v29 = vmul.f32 %v3130_v36, %v2646_v11 }
 0x483   :  { %v2662_v24 = vmul.f32 %v3132_v35, %v2661_v62 }
 0x484   :  { %v2648_v7 = vadd.f32 %v3130_v36, %v2647_v29 }
 0x485   :  { %v2663_v1 = vadd.f32 %v3132_v35, %v2662_v24 }
 0x486   :  { %v2652_v15 = vsel %vm2651_vm10, %v3130_v36, %v2648_v7 }
 0x487   :  { %v2657_v44 = vsel %vm2654_vm12, %v2656_v56, %v2652_v15  ;;  %v2667_v22 = vsel %vm2666_vm13, %v3132_v35, %v2663_v1 }
 0x488   :  { %v2674_v32 = vmul.f32 %v2657_v44, %v2526_v30  ;;  %v2672_v5 = vsel %vm2669_vm14, %v2671_v0, %v2667_v22 }
 0x489   :  { %v2675_v20 = vmul.f32 %v2672_v5, %v3993_v28 }
 0x48a   :  { %v2678_v19 = vadd.f32 %v2830_v23, %v2674_v32 }
 0x48b   :  { %v2679_v21 = vadd.f32 %v2831_v14, %v2675_v20 }
 0x48c   :  { %2681 = vst [vmem:[#allocation3 + $0x10] sm:$0xff] %v2678_v19 }
 0x48d   :  { %2682 = vst [vmem:[#allocation3 + $0x18] sm:$0xff] %v2679_v21 }
 0x48e   :  { %2695 = dma.vmem_to_hbm [thread:$0]  %s2688_s19, 512, %s2690_s7, [#allocation4], %s3174_s17, %s3174_s17, %s3169_s22  }
 0x48f   :  { %3161 = dma.done.wait [#allocation4], 512  }
 0x490   :  { %3162 = vsyncadd [#allocation4], 4294966784 }
 0x491   :  { %2700 = vsyncpa [#allocation4], 1 }

</bundles_post_ra>
